<compile_context>
chip_gen: v7x
topology: tpu7x:2x2x1
jax: 0.10.0
libtpu: 0.0.40
codegen_flags: <defaults>
</compile_context>

<pallas_src>
import functools

import jax
import jax.numpy as jnp
from jax.experimental import pallas as pl
from jax.experimental.pallas import tpu as pltpu


def _layernorm(x, g, b, eps=1e-12):
    # f32 LayerNorm over the true hidden size (H is not padded, so no masking needed).
    mu = jnp.mean(x, axis=-1, keepdims=True)
    var = jnp.mean((x - mu) ** 2, axis=-1, keepdims=True)
    return (x - mu) * jax.lax.rsqrt(var + eps) * g + b


def encoder_pool_kernel(emb_ref, mask_ref,
                        wqkv_ref, bqkv_ref,
                        wo_ref, bo_ref, w1_ref, b1_ref, w2_ref, b2_ref, ln_ref,
                        out_ref, *, hidden, seq_len, tile_seqs):
    """One grid step = `tile_seqs` whole sequences (tile_seqs * seq_len token rows).

    Dense matmuls run over the flattened token rows [TM, H]; attention scores /
    softmax are computed per-sequence via batched einsum; masked mean pooling is
    fused at the tail so only [tile_seqs, H] pooled rows are written out.
    """
    H, S, NS = hidden, seq_len, tile_seqs
    TM = NS * S

    # Hoisted LayerNorm params / biases (loaded once per grid step).
    g_emb = ln_ref[0:1, :]; b_emb = ln_ref[1:2, :]
    g1 = ln_ref[2:3, :];    b1n = ln_ref[3:4, :]
    g2 = ln_ref[4:5, :];    b2n = ln_ref[5:6, :]
    bqkv = bqkv_ref[...]
    bo = bo_ref[...]; b1 = b1_ref[...]; b2 = b2_ref[...]

    x = emb_ref[...].reshape(TM, H)          # [TM, H] f32 raw embeddings
    m = mask_ref[...]                        # [NS, S] f32 {0,1} attention mask

    # Embedding LayerNorm (f32).
    x = _layernorm(x, g_emb, b_emb)
    xb = x.astype(jnp.bfloat16)

    # --- single-head self-attention (BERT-style, additive key mask) ---
    # Fused QKV projection over the flattened token tile (bf16 MXU, f32 acc).
    qkv = jnp.dot(xb, wqkv_ref[...], preferred_element_type=jnp.float32) + bqkv
    # 128-aligned lane slices (H is a multiple of 128) -> no layout shuffles.
    q = qkv[:, 0:H]
    k = qkv[:, H:2 * H]
    v = qkv[:, 2 * H:3 * H]

    qb = q.reshape(NS, S, H).astype(jnp.bfloat16)
    kb = k.reshape(NS, S, H).astype(jnp.bfloat16)
    vb = v.reshape(NS, S, H).astype(jnp.bfloat16)

    scale = 1.0 / (float(H) ** 0.5)
    # Contract last dims directly (no .T / XLU transpose).
    scores = jnp.einsum('nqd,nkd->nqk', qb, kb,
                        preferred_element_type=jnp.float32) * scale   # [NS, S, S]
    scores = scores + (m[:, None, :] - 1.0) * 1e9                     # mask keys only
    # NOTE: padded *query* rows still produce values, but pooling masks them out.
    scores = scores - jnp.max(scores, axis=-1, keepdims=True)
    p = jnp.exp(scores)
    p = p * pl.reciprocal(jnp.sum(p, axis=-1, keepdims=True), approx=True)
    ctx = jnp.einsum('nqk,nkd->nqd', p.astype(jnp.bfloat16), vb,
                     preferred_element_type=jnp.float32)              # [NS, S, H]

    ctx_flat = ctx.reshape(TM, H).astype(jnp.bfloat16)
    attn_out = jnp.dot(ctx_flat, wo_ref[...],
                       preferred_element_type=jnp.float32) + bo
    h1 = _layernorm(x + attn_out, g1, b1n)

    # --- feed-forward with GELU (tanh approx; use approximate=False for exact
    #     HF-BERT erf parity if checkpoint parity ever matters) ---
    f = jnp.dot(h1.astype(jnp.bfloat16), w1_ref[...],
                preferred_element_type=jnp.float32) + b1
    f = jax.nn.gelu(f, approximate=True)
    f = jnp.dot(f.astype(jnp.bfloat16), w2_ref[...],
                preferred_element_type=jnp.float32) + b2
    h2 = _layernorm(h1 + f, g2, b2n)                                  # [TM, H] f32

    # --- fused masked mean pooling (SentenceBERT.forward body) ---
    # Sum over the sequence axis as an MXU matvec (mask row x hidden) instead of
    # a cross-sublane reduction.
    h2s = h2.reshape(NS, S, H)
    summed = jnp.einsum('nqs,nsh->nqh', m[:, None, :], h2s,
                        preferred_element_type=jnp.float32)[:, 0, :]  # [NS, H]
    denom = jnp.maximum(jnp.sum(m, axis=-1, keepdims=True), 1e-9)     # [NS, 1]
    out_ref[...] = summed * pl.reciprocal(denom, approx=True)


def init_params(key, vocab_size, max_pos, hidden):
    H = hidden
    ks = jax.random.split(key, 10)
    scale = 0.02
    bf = jnp.bfloat16
    params = {
        # embedding tables stay f32 (gather + LN happen in f32)
        "word_emb": scale * jax.random.normal(ks[0], (vocab_size, H), jnp.float32),
        "pos_emb":  scale * jax.random.normal(ks[1], (max_pos, H), jnp.float32),
        "type_emb": scale * jax.random.normal(ks[2], (1, H), jnp.float32),
        # matmul weights stored in bf16 (MXU operands); biases f32
        # fused QKV projection: [H, 3H] (q | k | v along lanes)
        "wqkv": (scale * jax.random.normal(ks[3], (H, 3 * H), jnp.float32)).astype(bf),
        "bqkv": jnp.zeros((1, 3 * H), jnp.float32),
        "wo": (scale * jax.random.normal(ks[6], (H, H), jnp.float32)).astype(bf),
        "bo": jnp.zeros((1, H), jnp.float32),
        "w1": (scale * jax.random.normal(ks[7], (H, 4 * H), jnp.float32)).astype(bf),
        "b1": jnp.zeros((1, 4 * H), jnp.float32),
        "w2": (scale * jax.random.normal(ks[8], (4 * H, H), jnp.float32)).astype(bf),
        "b2": jnp.zeros((1, H), jnp.float32),
        # rows: [ln_emb_gamma, ln_emb_beta, ln1_gamma, ln1_beta, ln2_gamma, ln2_beta]
        "ln": jnp.stack([jnp.ones(H), jnp.zeros(H), jnp.ones(H),
                         jnp.zeros(H), jnp.ones(H), jnp.zeros(H)]).astype(jnp.float32),
    }
    return params


@jax.jit
def sentence_bert_forward(params, input_ids, attention_mask):
    B, S = input_ids.shape
    H = params["wo"].shape[0]
    FF = params["w1"].shape[1]

    # Embedding lookup (glue; gather has no clean tiny-Pallas equivalent here).
    emb = (params["word_emb"][input_ids]
           + params["pos_emb"][jnp.arange(S)][None, :, :]
           + params["type_emb"][0][None, None, :]).astype(jnp.float32)
    maskf = attention_mask.astype(jnp.float32)                        # [B, S]

    # Sequences per grid step: fill the MXU M-dimension (target >=128 rows per
    # tile at real shapes) while dividing B.  At the toy shapes below this is
    # simply B (single grid step).
    tile_seqs = min(B, max(1, 128 // S))
    while B % tile_seqs != 0:
        tile_seqs -= 1
    grid = (B // tile_seqs,)

    kernel = functools.partial(encoder_pool_kernel,
                               hidden=H, seq_len=S, tile_seqs=tile_seqs)

    # NOTE: at real BERT sizes on v7x (64 MiB VMEM), keep weights bf16 (done)
    # and single-buffer the constant-index weight inputs; here they are tiny.
    pooled = pl.pallas_call(
        kernel,
        out_shape=jax.ShapeDtypeStruct((B, H), jnp.float32),
        grid=grid,
        in_specs=[
            pl.BlockSpec((tile_seqs, S, H), lambda t: (t, 0, 0)),   # embeddings
            pl.BlockSpec((tile_seqs, S),    lambda t: (t, 0)),      # attention mask
            pl.BlockSpec((H, 3 * H),        lambda t: (0, 0)),      # Wqkv (fused)
            pl.BlockSpec((1, 3 * H),        lambda t: (0, 0)),      # bqkv
            pl.BlockSpec((H, H),            lambda t: (0, 0)),      # Wo
            pl.BlockSpec((1, H),            lambda t: (0, 0)),      # bo
            pl.BlockSpec((H, FF),           lambda t: (0, 0)),      # W1
            pl.BlockSpec((1, FF),           lambda t: (0, 0)),      # b1
            pl.BlockSpec((FF, H),           lambda t: (0, 0)),      # W2
            pl.BlockSpec((1, H),            lambda t: (0, 0)),      # b2
            pl.BlockSpec((6, H),            lambda t: (0, 0)),      # LayerNorm params
        ],
        out_specs=pl.BlockSpec((tile_seqs, H), lambda t: (t, 0)),   # pooled [B, H]
        compiler_params=pltpu.CompilerParams(
            dimension_semantics=("parallel",),        # lets v7x split the grid across TCs
            vmem_limit_bytes=32 * 1024 * 1024,
        ),
    )(emb, maskf,
      params["wqkv"], params["bqkv"],
      params["wo"], params["bo"],
      params["w1"], params["b1"], params["w2"], params["b2"], params["ln"])

    return pooled                                # [B, H] mean_pooled_output


if __name__ == "__main__":
    B, S, H, VOCAB = 2, 8, 128, 50   # H lane-dense (multiple of 128)

    key = jax.random.PRNGKey(0)
    k_param, k_ids = jax.random.split(key)

    params = init_params(k_param, vocab_size=VOCAB, max_pos=S, hidden=H)
    input_ids = jax.random.randint(k_ids, (B, S), 0, VOCAB, dtype=jnp.int32)
    attention_mask = jnp.array(
        [[1, 1, 1, 1, 1, 1, 1, 1],
         [1, 1, 1, 1, 1, 0, 0, 0]], dtype=jnp.int32)

    out = sentence_bert_forward(params, input_ids, attention_mask)
    jax.block_until_ready(out)

    assert out.shape == (B, H) and out.dtype == jnp.float32
    assert bool(jnp.all(jnp.isfinite(out)))
    print("KERNEL_OK")
</pallas_src>

<mosaic_0001>
module attributes {stable_mosaic.version = 11 : i64} {
  func.func @encoder_pool_kernel(%arg0: i32, %arg1: memref<2x8x128xf32, #tpu.memory_space<vmem>>, %arg2: memref<2x8xf32, #tpu.memory_space<vmem>>, %arg3: memref<128x384xbf16, #tpu.memory_space<vmem>>, %arg4: memref<1x384xf32, #tpu.memory_space<vmem>>, %arg5: memref<128x128xbf16, #tpu.memory_space<vmem>>, %arg6: memref<1x128xf32, #tpu.memory_space<vmem>>, %arg7: memref<128x512xbf16, #tpu.memory_space<vmem>>, %arg8: memref<1x512xf32, #tpu.memory_space<vmem>>, %arg9: memref<512x128xbf16, #tpu.memory_space<vmem>>, %arg10: memref<1x128xf32, #tpu.memory_space<vmem>>, %arg11: memref<6x128xf32, #tpu.memory_space<vmem>>, %arg12: memref<2x128xf32, #tpu.memory_space<vmem>>) attributes {dimension_semantics = [#tpu.dimension_semantics<parallel>], iteration_bounds = array<i64: 1>, scalar_prefetch = 0 : i64, scratch_operands = 0 : i64, tpu.core_type = #tpu.core_type<tc>, window_params = [{transform_indices = @transform_0, window_bounds = array<i64: 2, 8, 128>}, {transform_indices = @transform_1, window_bounds = array<i64: 2, 8>}, {pipeline_mode = #tpu.pipeline_mode<synchronous>, transform_indices = @transform_2, window_bounds = array<i64: 128, 384>}, {pipeline_mode = #tpu.pipeline_mode<synchronous>, transform_indices = @transform_3, window_bounds = array<i64: 1, 384>}, {pipeline_mode = #tpu.pipeline_mode<synchronous>, transform_indices = @transform_4, window_bounds = array<i64: 128, 128>}, {pipeline_mode = #tpu.pipeline_mode<synchronous>, transform_indices = @transform_5, window_bounds = array<i64: 1, 128>}, {pipeline_mode = #tpu.pipeline_mode<synchronous>, transform_indices = @transform_6, window_bounds = array<i64: 128, 512>}, {pipeline_mode = #tpu.pipeline_mode<synchronous>, transform_indices = @transform_7, window_bounds = array<i64: 1, 512>}, {pipeline_mode = #tpu.pipeline_mode<synchronous>, transform_indices = @transform_8, window_bounds = array<i64: 512, 128>}, {pipeline_mode = #tpu.pipeline_mode<synchronous>, transform_indices = @transform_9, window_bounds = array<i64: 1, 128>}, {pipeline_mode = #tpu.pipeline_mode<synchronous>, transform_indices = @transform_10, window_bounds = array<i64: 6, 128>}, {transform_indices = @transform_11, window_bounds = array<i64: 2, 128>}]} {
    %c0 = arith.constant 0 : index
    %c0_0 = arith.constant 0 : index
    %0 = vector.load %arg11[%c0, %c0_0] : memref<6x128xf32, #tpu.memory_space<vmem>>, vector<1x128xf32>
    %c1 = arith.constant 1 : index
    %c0_1 = arith.constant 0 : index
    %1 = vector.load %arg11[%c1, %c0_1] : memref<6x128xf32, #tpu.memory_space<vmem>>, vector<1x128xf32>
    %c2 = arith.constant 2 : index
    %c0_2 = arith.constant 0 : index
    %2 = vector.load %arg11[%c2, %c0_2] : memref<6x128xf32, #tpu.memory_space<vmem>>, vector<1x128xf32>
    %c3 = arith.constant 3 : index
    %c0_3 = arith.constant 0 : index
    %3 = vector.load %arg11[%c3, %c0_3] : memref<6x128xf32, #tpu.memory_space<vmem>>, vector<1x128xf32>
    %c4 = arith.constant 4 : index
    %c0_4 = arith.constant 0 : index
    %4 = vector.load %arg11[%c4, %c0_4] : memref<6x128xf32, #tpu.memory_space<vmem>>, vector<1x128xf32>
    %c5 = arith.constant 5 : index
    %c0_5 = arith.constant 0 : index
    %5 = vector.load %arg11[%c5, %c0_5] : memref<6x128xf32, #tpu.memory_space<vmem>>, vector<1x128xf32>
    %c0_6 = arith.constant 0 : index
    %c0_7 = arith.constant 0 : index
    %6 = vector.load %arg4[%c0_6, %c0_7] : memref<1x384xf32, #tpu.memory_space<vmem>>, vector<1x384xf32>
    %c0_8 = arith.constant 0 : index
    %c0_9 = arith.constant 0 : index
    %7 = vector.load %arg6[%c0_8, %c0_9] : memref<1x128xf32, #tpu.memory_space<vmem>>, vector<1x128xf32>
    %c0_10 = arith.constant 0 : index
    %c0_11 = arith.constant 0 : index
    %8 = vector.load %arg8[%c0_10, %c0_11] : memref<1x512xf32, #tpu.memory_space<vmem>>, vector<1x512xf32>
    %c0_12 = arith.constant 0 : index
    %c0_13 = arith.constant 0 : index
    %9 = vector.load %arg10[%c0_12, %c0_13] : memref<1x128xf32, #tpu.memory_space<vmem>>, vector<1x128xf32>
    %c0_14 = arith.constant 0 : index
    %c0_15 = arith.constant 0 : index
    %c0_16 = arith.constant 0 : index
    %10 = vector.load %arg1[%c0_14, %c0_15, %c0_16] : memref<2x8x128xf32, #tpu.memory_space<vmem>>, vector<2x8x128xf32>
    %11 = vector.shape_cast %10 : vector<2x8x128xf32> to vector<16x128xf32>
    %c0_17 = arith.constant 0 : index
    %c0_18 = arith.constant 0 : index
    %12 = vector.load %arg2[%c0_17, %c0_18] : memref<2x8xf32, #tpu.memory_space<vmem>>, vector<2x8xf32>
    %cst = arith.constant dense<0.000000e+00> : vector<16xf32>
    %13 = vector.multi_reduction <add>, %11, %cst [1] : vector<16x128xf32> to vector<16xf32>
    %14 = vector.shape_cast %13 : vector<16xf32> to vector<16x1xf32>
    %cst_19 = arith.constant 1.280000e+02 : f32
    %15 = vector.broadcast %cst_19 : f32 to vector<16x1xf32>
    %16 = arith.divf %14, %15 : vector<16x1xf32>
    %17 = vector.broadcast %16 : vector<16x1xf32> to vector<16x128xf32>
    %18 = arith.subf %11, %17 : vector<16x128xf32>
    %19 = arith.mulf %18, %18 : vector<16x128xf32>
    %cst_20 = arith.constant dense<0.000000e+00> : vector<16xf32>
    %20 = vector.multi_reduction <add>, %19, %cst_20 [1] : vector<16x128xf32> to vector<16xf32>
    %21 = vector.shape_cast %20 : vector<16xf32> to vector<16x1xf32>
    %cst_21 = arith.constant 1.280000e+02 : f32
    %22 = vector.broadcast %cst_21 : f32 to vector<16x1xf32>
    %23 = arith.divf %21, %22 : vector<16x1xf32>
    %24 = vector.broadcast %16 : vector<16x1xf32> to vector<16x128xf32>
    %25 = arith.subf %11, %24 : vector<16x128xf32>
    %cst_22 = arith.constant 9.99999996E-13 : f32
    %26 = vector.broadcast %cst_22 : f32 to vector<16x1xf32>
    %27 = arith.addf %23, %26 : vector<16x1xf32>
    %28 = math.rsqrt %27 : vector<16x1xf32>
    %29 = vector.broadcast %28 : vector<16x1xf32> to vector<16x128xf32>
    %30 = arith.mulf %25, %29 : vector<16x128xf32>
    %31 = vector.broadcast %0 : vector<1x128xf32> to vector<16x128xf32>
    %32 = arith.mulf %30, %31 : vector<16x128xf32>
    %33 = vector.broadcast %1 : vector<1x128xf32> to vector<16x128xf32>
    %34 = arith.addf %32, %33 : vector<16x128xf32>
    %35 = arith.truncf %34 : vector<16x128xf32> to vector<16x128xbf16>
    %c0_23 = arith.constant 0 : index
    %c0_24 = arith.constant 0 : index
    %36 = vector.load %arg3[%c0_23, %c0_24] : memref<128x384xbf16, #tpu.memory_space<vmem>>, vector<128x384xbf16>
    %cst_25 = arith.constant dense<0.000000e+00> : vector<16x384xf32>
    %37 = tpu.matmul %35, %36, %cst_25 {dimension_numbers = #tpu.dot_dimension_numbers<[1], [0], [0], [1], [0, 0, 1, 1], [], []>} : vector<16x128xbf16>, vector<128x384xbf16>, vector<16x384xf32> -> vector<16x384xf32>
    %38 = vector.broadcast %6 : vector<1x384xf32> to vector<16x384xf32>
    %39 = arith.addf %37, %38 : vector<16x384xf32>
    %40 = vector.extract_strided_slice %39 {offsets = [0, 0], sizes = [16, 128], strides = [1, 1]} : vector<16x384xf32> to vector<16x128xf32>
    %41 = vector.extract_strided_slice %39 {offsets = [0, 128], sizes = [16, 128], strides = [1, 1]} : vector<16x384xf32> to vector<16x128xf32>
    %42 = vector.extract_strided_slice %39 {offsets = [0, 256], sizes = [16, 128], strides = [1, 1]} : vector<16x384xf32> to vector<16x128xf32>
    %43 = vector.shape_cast %40 : vector<16x128xf32> to vector<2x8x128xf32>
    %44 = arith.truncf %43 : vector<2x8x128xf32> to vector<2x8x128xbf16>
    %45 = vector.shape_cast %41 : vector<16x128xf32> to vector<2x8x128xf32>
    %46 = arith.truncf %45 : vector<2x8x128xf32> to vector<2x8x128xbf16>
    %47 = vector.shape_cast %42 : vector<16x128xf32> to vector<2x8x128xf32>
    %48 = arith.truncf %47 : vector<2x8x128xf32> to vector<2x8x128xbf16>
    "tpu.trace_start"() <{level = 10 : i32, message = "nqd,nkd->nqk"}> : () -> ()
    %cst_26 = arith.constant dense<0.000000e+00> : vector<2x8x8xf32>
    %49 = tpu.matmul %44, %46, %cst_26 {dimension_numbers = #tpu.dot_dimension_numbers<[2], [2], [1], [1], [0, 0, 0, 1, 1, 1], [0], [0]>} : vector<2x8x128xbf16>, vector<2x8x128xbf16>, vector<2x8x8xf32> -> vector<2x8x8xf32>
    "tpu.trace_stop"() : () -> ()
    %cst_27 = arith.constant 0.0883883461 : f32
    %50 = vector.broadcast %cst_27 : f32 to vector<2x8x8xf32>
    %51 = arith.mulf %49, %50 : vector<2x8x8xf32>
    %52 = vector.shape_cast %12 : vector<2x8xf32> to vector<2x1x8xf32>
    %cst_28 = arith.constant 1.000000e+00 : f32
    %53 = vector.broadcast %cst_28 : f32 to vector<2x1x8xf32>
    %54 = arith.subf %52, %53 : vector<2x1x8xf32>
    %cst_29 = arith.constant 1.000000e+09 : f32
    %55 = vector.broadcast %cst_29 : f32 to vector<2x1x8xf32>
    %56 = arith.mulf %54, %55 : vector<2x1x8xf32>
    %57 = vector.broadcast %56 : vector<2x1x8xf32> to vector<2x8x8xf32>
    %58 = arith.addf %51, %57 : vector<2x8x8xf32>
    %cst_30 = arith.constant dense<0xFF800000> : vector<2x8xf32>
    %59 = vector.multi_reduction <maximumf>, %58, %cst_30 [2] : vector<2x8x8xf32> to vector<2x8xf32>
    %60 = vector.shape_cast %59 : vector<2x8xf32> to vector<2x8x1xf32>
    %61 = vector.broadcast %60 : vector<2x8x1xf32> to vector<2x8x8xf32>
    %62 = arith.subf %58, %61 : vector<2x8x8xf32>
    %63 = math.exp %62 : vector<2x8x8xf32>
    %cst_31 = arith.constant dense<0.000000e+00> : vector<2x8xf32>
    %64 = vector.multi_reduction <add>, %63, %cst_31 [2] : vector<2x8x8xf32> to vector<2x8xf32>
    %65 = vector.shape_cast %64 : vector<2x8xf32> to vector<2x8x1xf32>
    %66 = tpu.reciprocal %65 {approx = true} : vector<2x8x1xf32> -> vector<2x8x1xf32>
    %67 = vector.broadcast %66 : vector<2x8x1xf32> to vector<2x8x8xf32>
    %68 = arith.mulf %63, %67 : vector<2x8x8xf32>
    %69 = arith.truncf %68 : vector<2x8x8xf32> to vector<2x8x8xbf16>
    "tpu.trace_start"() <{level = 10 : i32, message = "nqk,nkd->nqd"}> : () -> ()
    %cst_32 = arith.constant dense<0.000000e+00> : vector<2x8x128xf32>
    %70 = tpu.matmul %69, %48, %cst_32 {dimension_numbers = #tpu.dot_dimension_numbers<[2], [1], [1], [2], [0, 0, 0, 1, 1, 2], [0], [0]>} : vector<2x8x8xbf16>, vector<2x8x128xbf16>, vector<2x8x128xf32> -> vector<2x8x128xf32>
    "tpu.trace_stop"() : () -> ()
    %71 = vector.shape_cast %70 : vector<2x8x128xf32> to vector<16x128xf32>
    %72 = arith.truncf %71 : vector<16x128xf32> to vector<16x128xbf16>
    %c0_33 = arith.constant 0 : index
    %c0_34 = arith.constant 0 : index
    %73 = vector.load %arg5[%c0_33, %c0_34] : memref<128x128xbf16, #tpu.memory_space<vmem>>, vector<128x128xbf16>
    %cst_35 = arith.constant dense<0.000000e+00> : vector<16x128xf32>
    %74 = tpu.matmul %72, %73, %cst_35 {dimension_numbers = #tpu.dot_dimension_numbers<[1], [0], [0], [1], [0, 0, 1, 1], [], []>} : vector<16x128xbf16>, vector<128x128xbf16>, vector<16x128xf32> -> vector<16x128xf32>
    %75 = vector.broadcast %7 : vector<1x128xf32> to vector<16x128xf32>
    %76 = arith.addf %74, %75 : vector<16x128xf32>
    %77 = arith.addf %34, %76 : vector<16x128xf32>
    %cst_36 = arith.constant dense<0.000000e+00> : vector<16xf32>
    %78 = vector.multi_reduction <add>, %77, %cst_36 [1] : vector<16x128xf32> to vector<16xf32>
    %79 = vector.shape_cast %78 : vector<16xf32> to vector<16x1xf32>
    %cst_37 = arith.constant 1.280000e+02 : f32
    %80 = vector.broadcast %cst_37 : f32 to vector<16x1xf32>
    %81 = arith.divf %79, %80 : vector<16x1xf32>
    %82 = vector.broadcast %81 : vector<16x1xf32> to vector<16x128xf32>
    %83 = arith.subf %77, %82 : vector<16x128xf32>
    %84 = arith.mulf %83, %83 : vector<16x128xf32>
    %cst_38 = arith.constant dense<0.000000e+00> : vector<16xf32>
    %85 = vector.multi_reduction <add>, %84, %cst_38 [1] : vector<16x128xf32> to vector<16xf32>
    %86 = vector.shape_cast %85 : vector<16xf32> to vector<16x1xf32>
    %cst_39 = arith.constant 1.280000e+02 : f32
    %87 = vector.broadcast %cst_39 : f32 to vector<16x1xf32>
    %88 = arith.divf %86, %87 : vector<16x1xf32>
    %89 = vector.broadcast %81 : vector<16x1xf32> to vector<16x128xf32>
    %90 = arith.subf %77, %89 : vector<16x128xf32>
    %cst_40 = arith.constant 9.99999996E-13 : f32
    %91 = vector.broadcast %cst_40 : f32 to vector<16x1xf32>
    %92 = arith.addf %88, %91 : vector<16x1xf32>
    %93 = math.rsqrt %92 : vector<16x1xf32>
    %94 = vector.broadcast %93 : vector<16x1xf32> to vector<16x128xf32>
    %95 = arith.mulf %90, %94 : vector<16x128xf32>
    %96 = vector.broadcast %2 : vector<1x128xf32> to vector<16x128xf32>
    %97 = arith.mulf %95, %96 : vector<16x128xf32>
    %98 = vector.broadcast %3 : vector<1x128xf32> to vector<16x128xf32>
    %99 = arith.addf %97, %98 : vector<16x128xf32>
    %100 = arith.truncf %99 : vector<16x128xf32> to vector<16x128xbf16>
    %c0_41 = arith.constant 0 : index
    %c0_42 = arith.constant 0 : index
    %101 = vector.load %arg7[%c0_41, %c0_42] : memref<128x512xbf16, #tpu.memory_space<vmem>>, vector<128x512xbf16>
    %cst_43 = arith.constant dense<0.000000e+00> : vector<16x512xf32>
    %102 = tpu.matmul %100, %101, %cst_43 {dimension_numbers = #tpu.dot_dimension_numbers<[1], [0], [0], [1], [0, 0, 1, 1], [], []>} : vector<16x128xbf16>, vector<128x512xbf16>, vector<16x512xf32> -> vector<16x512xf32>
    %103 = vector.broadcast %8 : vector<1x512xf32> to vector<16x512xf32>
    %104 = arith.addf %102, %103 : vector<16x512xf32>
    %105 = arith.mulf %104, %104 : vector<16x512xf32>
    %106 = arith.mulf %104, %105 : vector<16x512xf32>
    %cst_44 = arith.constant 4.471500e-02 : f32
    %107 = vector.broadcast %cst_44 : f32 to vector<16x512xf32>
    %108 = arith.mulf %107, %106 : vector<16x512xf32>
    %109 = arith.addf %104, %108 : vector<16x512xf32>
    %cst_45 = arith.constant 0.797884583 : f32
    %110 = vector.broadcast %cst_45 : f32 to vector<16x512xf32>
    %111 = arith.mulf %110, %109 : vector<16x512xf32>
    %112 = math.tanh %111 : vector<16x512xf32>
    %cst_46 = arith.constant 1.000000e+00 : f32
    %113 = vector.broadcast %cst_46 : f32 to vector<16x512xf32>
    %114 = arith.addf %113, %112 : vector<16x512xf32>
    %cst_47 = arith.constant 5.000000e-01 : f32
    %115 = vector.broadcast %cst_47 : f32 to vector<16x512xf32>
    %116 = arith.mulf %115, %114 : vector<16x512xf32>
    %117 = arith.mulf %104, %116 : vector<16x512xf32>
    %118 = arith.truncf %117 : vector<16x512xf32> to vector<16x512xbf16>
    %c0_48 = arith.constant 0 : index
    %c0_49 = arith.constant 0 : index
    %119 = vector.load %arg9[%c0_48, %c0_49] : memref<512x128xbf16, #tpu.memory_space<vmem>>, vector<512x128xbf16>
    %cst_50 = arith.constant dense<0.000000e+00> : vector<16x128xf32>
    %120 = tpu.matmul %118, %119, %cst_50 {dimension_numbers = #tpu.dot_dimension_numbers<[1], [0], [0], [1], [0, 0, 1, 1], [], []>} : vector<16x512xbf16>, vector<512x128xbf16>, vector<16x128xf32> -> vector<16x128xf32>
    %121 = vector.broadcast %9 : vector<1x128xf32> to vector<16x128xf32>
    %122 = arith.addf %120, %121 : vector<16x128xf32>
    %123 = arith.addf %99, %122 : vector<16x128xf32>
    %cst_51 = arith.constant dense<0.000000e+00> : vector<16xf32>
    %124 = vector.multi_reduction <add>, %123, %cst_51 [1] : vector<16x128xf32> to vector<16xf32>
    %125 = vector.shape_cast %124 : vector<16xf32> to vector<16x1xf32>
    %cst_52 = arith.constant 1.280000e+02 : f32
    %126 = vector.broadcast %cst_52 : f32 to vector<16x1xf32>
    %127 = arith.divf %125, %126 : vector<16x1xf32>
    %128 = vector.broadcast %127 : vector<16x1xf32> to vector<16x128xf32>
    %129 = arith.subf %123, %128 : vector<16x128xf32>
    %130 = arith.mulf %129, %129 : vector<16x128xf32>
    %cst_53 = arith.constant dense<0.000000e+00> : vector<16xf32>
    %131 = vector.multi_reduction <add>, %130, %cst_53 [1] : vector<16x128xf32> to vector<16xf32>
    %132 = vector.shape_cast %131 : vector<16xf32> to vector<16x1xf32>
    %cst_54 = arith.constant 1.280000e+02 : f32
    %133 = vector.broadcast %cst_54 : f32 to vector<16x1xf32>
    %134 = arith.divf %132, %133 : vector<16x1xf32>
    %135 = vector.broadcast %127 : vector<16x1xf32> to vector<16x128xf32>
    %136 = arith.subf %123, %135 : vector<16x128xf32>
    %cst_55 = arith.constant 9.99999996E-13 : f32
    %137 = vector.broadcast %cst_55 : f32 to vector<16x1xf32>
    %138 = arith.addf %134, %137 : vector<16x1xf32>
    %139 = math.rsqrt %138 : vector<16x1xf32>
    %140 = vector.broadcast %139 : vector<16x1xf32> to vector<16x128xf32>
    %141 = arith.mulf %136, %140 : vector<16x128xf32>
    %142 = vector.broadcast %4 : vector<1x128xf32> to vector<16x128xf32>
    %143 = arith.mulf %141, %142 : vector<16x128xf32>
    %144 = vector.broadcast %5 : vector<1x128xf32> to vector<16x128xf32>
    %145 = arith.addf %143, %144 : vector<16x128xf32>
    %146 = vector.shape_cast %145 : vector<16x128xf32> to vector<2x8x128xf32>
    %147 = vector.shape_cast %12 : vector<2x8xf32> to vector<2x1x8xf32>
    "tpu.trace_start"() <{level = 10 : i32, message = "nqs,nsh->nqh"}> : () -> ()
    %cst_56 = arith.constant dense<0.000000e+00> : vector<2x1x128xf32>
    %148 = tpu.matmul %147, %146, %cst_56 {dimension_numbers = #tpu.dot_dimension_numbers<[2], [1], [1], [2], [0, 0, 0, 1, 1, 2], [0], [0]>} : vector<2x1x8xf32>, vector<2x8x128xf32>, vector<2x1x128xf32> -> vector<2x1x128xf32>
    "tpu.trace_stop"() : () -> ()
    %149 = vector.shape_cast %148 : vector<2x1x128xf32> to vector<2x128xf32>
    %cst_57 = arith.constant dense<0.000000e+00> : vector<2xf32>
    %150 = vector.multi_reduction <add>, %12, %cst_57 [1] : vector<2x8xf32> to vector<2xf32>
    %151 = vector.shape_cast %150 : vector<2xf32> to vector<2x1xf32>
    %cst_58 = arith.constant 9.99999971E-10 : f32
    %152 = vector.broadcast %cst_58 : f32 to vector<2x1xf32>
    %153 = arith.maximumf %151, %152 : vector<2x1xf32>
    %154 = tpu.reciprocal %153 {approx = true} : vector<2x1xf32> -> vector<2x1xf32>
    %155 = vector.broadcast %154 : vector<2x1xf32> to vector<2x128xf32>
    %156 = arith.mulf %149, %155 : vector<2x128xf32>
    %c0_59 = arith.constant 0 : index
    %c0_60 = arith.constant 0 : index
    %157 = vector.load %arg12[%c0_59, %c0_60] : memref<2x128xf32, #tpu.memory_space<vmem>>, vector<2x128xf32>
    tpu.vector_store %arg12[%c0_59, %c0_60], %156 {strides = array<i32>} : memref<2x128xf32, #tpu.memory_space<vmem>>, vector<2x128xf32>,
    return
  }
  func.func @transform_0(%arg0: i32) -> (i32, i32, i32) {
    %c0_i32 = arith.constant 0 : i32
    %c0_i32_0 = arith.constant 0 : i32
    %c0_i32_1 = arith.constant 0 : i32
    return %arg0, %c0_i32, %c0_i32_0 : i32, i32, i32
  }
  func.func @transform_1(%arg0: i32) -> (i32, i32) {
    %c0_i32 = arith.constant 0 : i32
    %c0_i32_0 = arith.constant 0 : i32
    return %arg0, %c0_i32 : i32, i32
  }
  func.func @transform_2(%arg0: i32) -> (i32, i32) {
    %c0_i32 = arith.constant 0 : i32
    %c0_i32_0 = arith.constant 0 : i32
    %c0_i32_1 = arith.constant 0 : i32
    return %c0_i32, %c0_i32_0 : i32, i32
  }
  func.func @transform_3(%arg0: i32) -> (i32, i32) {
    %c0_i32 = arith.constant 0 : i32
    %c0_i32_0 = arith.constant 0 : i32
    %c0_i32_1 = arith.constant 0 : i32
    return %c0_i32, %c0_i32_0 : i32, i32
  }
  func.func @transform_4(%arg0: i32) -> (i32, i32) {
    %c0_i32 = arith.constant 0 : i32
    %c0_i32_0 = arith.constant 0 : i32
    %c0_i32_1 = arith.constant 0 : i32
    return %c0_i32, %c0_i32_0 : i32, i32
  }
  func.func @transform_5(%arg0: i32) -> (i32, i32) {
    %c0_i32 = arith.constant 0 : i32
    %c0_i32_0 = arith.constant 0 : i32
    %c0_i32_1 = arith.constant 0 : i32
    return %c0_i32, %c0_i32_0 : i32, i32
  }
  func.func @transform_6(%arg0: i32) -> (i32, i32) {
    %c0_i32 = arith.constant 0 : i32
    %c0_i32_0 = arith.constant 0 : i32
    %c0_i32_1 = arith.constant 0 : i32
    return %c0_i32, %c0_i32_0 : i32, i32
  }
  func.func @transform_7(%arg0: i32) -> (i32, i32) {
    %c0_i32 = arith.constant 0 : i32
    %c0_i32_0 = arith.constant 0 : i32
    %c0_i32_1 = arith.constant 0 : i32
    return %c0_i32, %c0_i32_0 : i32, i32
  }
  func.func @transform_8(%arg0: i32) -> (i32, i32) {
    %c0_i32 = arith.constant 0 : i32
    %c0_i32_0 = arith.constant 0 : i32
    %c0_i32_1 = arith.constant 0 : i32
    return %c0_i32, %c0_i32_0 : i32, i32
  }
  func.func @transform_9(%arg0: i32) -> (i32, i32) {
    %c0_i32 = arith.constant 0 : i32
    %c0_i32_0 = arith.constant 0 : i32
    %c0_i32_1 = arith.constant 0 : i32
    return %c0_i32, %c0_i32_0 : i32, i32
  }
  func.func @transform_10(%arg0: i32) -> (i32, i32) {
    %c0_i32 = arith.constant 0 : i32
    %c0_i32_0 = arith.constant 0 : i32
    %c0_i32_1 = arith.constant 0 : i32
    return %c0_i32, %c0_i32_0 : i32, i32
  }
  func.func @transform_11(%arg0: i32) -> (i32, i32) {
    %c0_i32 = arith.constant 0 : i32
    %c0_i32_0 = arith.constant 0 : i32
    return %arg0, %c0_i32 : i32, i32
  }
}

</mosaic_0001>

<bundles_post_ra>
// kernel: sentence_bert_forward.1
= control target key start
LH: loop header
LB: loop body
LE: loop exit
PB: predicated region body
PF: predicated region fallthrough
CT: control target
= control target key end

     0   :  { %16 = vsyncpa [#allocation3], 0  ;;  %s2607_s0 = inlined_call_operand.vmem [shape: f32[2,8,128], index: 0, kind: input, shape index: {}]   ;;  %s2608_s1 = inlined_call_operand.vmem [shape: f32[2,8], index: 1, kind: input, shape index: {}]   ;;  %s2609_s2 = inlined_call_operand.hbm [shape: bf16[128,384], index: 2, kind: input, shape index: {}]   ;;  %s2610_s3 = inlined_call_operand.vmem [shape: f32[1,384], index: 3, kind: input, shape index: {}]   ;;  %s2611_s4 = inlined_call_operand.vmem [shape: bf16[128,128], index: 4, kind: input, shape index: {}]   ;;  %s2612_s5 = inlined_call_operand.vmem [shape: f32[1,128], index: 5, kind: input, shape index: {}]   ;;  %s2613_s6 = inlined_call_operand.hbm [shape: bf16[128,512], index: 6, kind: input, shape index: {}]   ;;  %s2614_s7 = inlined_call_operand.vmem [shape: f32[1,512], index: 7, kind: input, shape index: {}]   ;;  %s2615_s8 = inlined_call_operand.hbm [shape: bf16[512,128], index: 8, kind: input, shape index: {}]   ;;  %s2616_s9 = inlined_call_operand.vmem [shape: f32[1,128], index: 9, kind: input, shape index: {}]   ;;  %s2617_s10 = inlined_call_operand.vmem [shape: f32[6,128], index: 10, kind: input, shape index: {}]   ;;  %s2618_s11 = inlined_call_operand.hbm [shape: f32[2,128], index: 11, kind: output, shape index: {}]  }
   0x1   :  { %17 = vsyncpa [#allocation6], 0 }
   0x2   :  { %18 = vsyncpa [#allocation4], 0  ;;  %s2246_s17 = smov [#allocation5]   ;;  %s2152_s21 = scalar_lea.hbm %s2613_s6, 4096 }
   0x3   :  { %s46_s18 = sshll.u32 %s2246_s17, 4  ;;  %p2153_p0 = scmp.ne.s32.totalorder %s2613_s6, %s2152_s21  ;;  %s47_s18 = int_to_ptr.vmem [resolvable:$true] %s46_s18 }
   0x4   :  { %p2156_p1 = scmp.lt.u32.totalorder %s2152_s21, %s2613_s6 }
   0x6   :  { %p2158_p2 = pnand %p2156_p1, %p2153_p0 }
   0x8   :  { %2161 = shalt.err (!%p2158_p2)
}
   0x9   :  { %s2162_s26 = scalar_lea.vmem %s47_s18, 4096  ;;  %p2167_p4 = scmp.lt.s32.totalorder %s47_s18, %s47_s18 }
   0xa   :  { %p2163_p3 = scmp.ne.s32.totalorder %s47_s18, %s2162_s26  ;;  %p2168_p5 = scmp.lt.s32.totalorder %s2162_s26, %s2162_s26 }
   0xc   :  { %p2169_p6 = por %p2168_p5, %p2167_p4 }
   0xe   :  { %p2170_p7 = pnand %p2169_p6, %p2163_p3 }
  0x10   :  { %2173 = shalt.err (!%p2170_p7)
}
  0x11   :  { %s2247_s27 = smov 256   ;;  %s2248_s28 = smov 16  }
  0x12   :  { %52 = dma.hbm_to_vmem [thread:$0]  %s2613_s6, 4096, %s47_s18, [#allocation6], %s2247_s27, %s2247_s27, %s2248_s28  }
  0x13   :  { %s2249_s12 = smov [#allocation2]   ;;  %s2174_s16 = scalar_lea.hbm %s2609_s2, 3072 }
  0x14   :  { %s28_s13 = sshll.u32 %s2249_s12, 4  ;;  %p2175_p8 = scmp.ne.s32.totalorder %s2609_s2, %s2174_s16  ;;  %s29_s13 = int_to_ptr.vmem [resolvable:$true] %s28_s13 }
  0x15   :  { %p2178_p9 = scmp.lt.u32.totalorder %s2174_s16, %s2609_s2 }
  0x17   :  { %p2180_p10 = pnand %p2178_p9, %p2175_p8 }
  0x19   :  { %2183 = shalt.err (!%p2180_p10)
}
  0x1a   :  { %s2184_s22 = scalar_lea.vmem %s29_s13, 3072  ;;  %p2189_p12 = scmp.lt.s32.totalorder %s29_s13, %s29_s13 }
  0x1b   :  { %p2185_p11 = scmp.ne.s32.totalorder %s29_s13, %s2184_s22  ;;  %p2190_p13 = scmp.lt.s32.totalorder %s2184_s22, %s2184_s22 }
  0x1d   :  { %p2191_p0 = por %p2190_p13, %p2189_p12 }
  0x1f   :  { %p2192_p1 = pnand %p2191_p0, %p2185_p11 }
  0x21   :  { %2195 = shalt.err (!%p2192_p1)
}
  0x22   :  { %s2250_s6 = smov 192   ;;  %s2251_s18 = smov 12  }
  0x23   :  { %34 = dma.hbm_to_vmem [thread:$0]  %s2609_s2, 3072, %s29_s13, [#allocation3], %s2250_s6, %s2250_s6, %s2251_s18  }
  0x24   :  { %s2252_s25 = smov [#allocation7]   ;;  %s2196_s29 = scalar_lea.hbm %s2615_s8, 4096 }
  0x25   :  { %s60_s26 = sshll.u32 %s2252_s25, 4  ;;  %p2197_p2 = scmp.ne.s32.totalorder %s2615_s8, %s2196_s29  ;;  %s61_s26 = int_to_ptr.vmem [resolvable:$true] %s60_s26 }
  0x26   :  { %p2200_p3 = scmp.lt.u32.totalorder %s2196_s29, %s2615_s8 }
  0x28   :  { %p2202_p4 = pnand %p2200_p3, %p2197_p2 }
  0x2a   :  { %2205 = shalt.err (!%p2202_p4)
}
  0x2b   :  { %s2206_s16 = scalar_lea.vmem %s61_s26, 4096  ;;  %p2211_p6 = scmp.lt.s32.totalorder %s61_s26, %s61_s26 }
  0x2c   :  { %p2207_p5 = scmp.ne.s32.totalorder %s61_s26, %s2206_s16  ;;  %p2212_p7 = scmp.lt.s32.totalorder %s2206_s16, %s2206_s16 }
  0x2e   :  { %p2213_p8 = por %p2212_p7, %p2211_p6 }
  0x30   :  { %p2214_p9 = pnand %p2213_p8, %p2207_p5 }
  0x32   :  { %2217 = shalt.err (!%p2214_p9)
}
  0x33   :  { %s2253_s2 = smov 64   ;;  %s2254_s13 = smov 4  }
  0x34   :  { %66 = dma.hbm_to_vmem [thread:$0]  %s2615_s8, 4096, %s61_s26, [#allocation6], %s2253_s2, %s2253_s2, %s2254_s13  }
  0x35   :  { %2240 = dma.done.wait [#allocation3], 3072  }
  0x36   :  { %2241 = vsyncadd [#allocation3], 4294964224 }
  0x37   :  { %2242 = dma.done.wait [#allocation6], 8192  }
  0x38   :  { %2243 = vsyncadd [#allocation6], 4294959104  ;;  %v91_v0 = vld [vmem:[%s2607_s0] sm:$0xff]  ;;  %v92_v1 = vld [vmem:[%s2607_s0 + $0x8] sm:$0xff]  ;;  %v2255_v4 = vmov 0.0   ;;  %v2256_v30 = vmov 0   ;;  %v163_v53 = vlaneseq }
  0x39   :  { %94 = vadd.xlane.f32.xlu0 %v91_v0  ;;  %v1994_v2 = vld [vmem:[#allocation2 + $0x4] ss:$12 sps:$4 sm:$0xff]   ;;  %v1996_v3 = vld [vmem:[#allocation2] ss:$12 sps:$4 sm:$0xff]   ;;  %1906 = vmatprep.subr.bf16.mxu1 %v2255_v4  ;;  %v1997_v5 = vld [vmem:[#allocation2 + $0x8] ss:$12 sps:$4 sm:$0xff]  }
  0x3a   :  { %v1998_v6 = vld [vmem:[#allocation2 + $0x1c] ss:$12 sps:$4 sm:$0xff]   ;;  %306 = vmatprep.subr.bf16.mxu0 %v1994_v2  ;;  %1907 = vmatpush3.bf16.msra.mxu1 %v1997_v5  ;;  %v2000_v15 = vld [vmem:[#allocation2 + $0x18] ss:$12 sps:$4 sm:$0xff]   ;;  %v2001_v16 = vld [vmem:[#allocation2 + $0x20] ss:$12 sps:$4 sm:$0xff]  }
  0x3b   :  { %307 = vmatpush1.bf16.msra.mxu0 %v1996_v3  ;;  %1908 = vmatprep.subr.bf16.mxu1 %v2255_v4  ;;  %v2002_v17 = vld [vmem:[#allocation2 + $0x34] ss:$12 sps:$4 sm:$0xff]   ;;  %v2004_v18 = vld [vmem:[#allocation2 + $0x30] ss:$12 sps:$4 sm:$0xff]   ;;  %v2005_v19 = vld [vmem:[#allocation2 + $0x38] ss:$12 sps:$4 sm:$0xff]  }
  0x3c   :  { %308 = vmatprep.subr.bf16.mxu0 %v1998_v6  ;;  %v2006_v20 = vld [vmem:[#allocation2 + $0x4c] ss:$12 sps:$4 sm:$0xff]   ;;  %v2008_v21 = vld [vmem:[#allocation2 + $0x48] ss:$12 sps:$4 sm:$0xff]   ;;  %v2009_v22 = vld [vmem:[#allocation2 + $0x50] ss:$12 sps:$4 sm:$0xff]   ;;  %338 = vmatprep.mubr.bf16.mxu0 %v2256_v30 }
  0x3d   :  { %96 = vadd.xlane.f32.xlu0 %v92_v1  ;;  %v2010_v23 = vld [vmem:[#allocation2 + $0x64] ss:$12 sps:$4 sm:$0xff]   ;;  %v2012_v24 = vld [vmem:[#allocation2 + $0x60] ss:$12 sps:$4 sm:$0xff]   ;;  %v2013_v25 = vld [vmem:[#allocation2 + $0x68] ss:$12 sps:$4 sm:$0xff]  }
  0x3e   :  { %1909 = vmatpush3.bf16.msra.mxu1 %v2001_v16  ;;  %v2014_v26 = vld [vmem:[#allocation2 + $0x7c] ss:$12 sps:$4 sm:$0xff]   ;;  %v2016_v27 = vld [vmem:[#allocation2 + $0x78] ss:$12 sps:$4 sm:$0xff]   ;;  %v2017_v28 = vld [vmem:[#allocation2 + $0x80] ss:$12 sps:$4 sm:$0xff]  }
  0x3f   :  { %309 = vmatpush1.bf16.msra.mxu0 %v2000_v15  ;;  %1910 = vmatprep.subr.bf16.mxu1 %v2255_v4  ;;  %v2018_v29 = vld [vmem:[#allocation2 + $0x94] ss:$12 sps:$4 sm:$0xff]   ;;  %vm2257_vm0 = vmmov 0   ;;  %v2020_v31 = vld [vmem:[#allocation2 + $0x90] ss:$12 sps:$4 sm:$0xff]   ;;  %v2401_v54 = vshrl.u32 %v163_v53, 7 }
  0x40   :  { %310 = vmatprep.subr.bf16.mxu0 %v2002_v17  ;;  %1922 = vmatprep.mubr.msk.bf16.mxu1 %vm2257_vm0, %v2255_v4  ;;  %v2021_v32 = vld [vmem:[#allocation2 + $0x98] ss:$12 sps:$4 sm:$0xff]   ;;  %v2024_v34 = vld [vmem:[#allocation2 + $0xa8] ss:$12 sps:$4 sm:$0xff]   ;;  %v2025_v35 = vld [vmem:[#allocation2 + $0xb0] ss:$12 sps:$4 sm:$0xff]  }
  0x41   :  { %v2022_v33 = vld [vmem:[#allocation2 + $0xac] ss:$12 sps:$4 sm:$0xff]   ;;  %v1722_v44 = vld [vmem:[%s2617_s10] ss:$0 sm:$0xff]  ;;  %v1723_v48 = vld [vmem:[%s2617_s10 + $0x1] ss:$0 sm:$0xff] }
  0x42   :  { %1911 = vmatpush3.bf16.msra.mxu1 %v2005_v19  ;;  %v173_v55 = vsub.s32 2, %v2401_v54  ;;  %v87_v56 = vld [vmem:[%s2610_s3] sm:$0x7]  ;;  %v169_v57 = vsub.s32 1, %v2401_v54  ;;  %v2413_v60 = vsub.s32 0, %v2401_v54  ;;  %vm549_vm1 = vcmask 1043456  }
  0x43   :  { %311 = vmatpush1.bf16.msra.mxu0 %v2004_v18  ;;  %1912 = vmatprep.subr.bf16.mxu1 %v2255_v4  ;;  %vm521_vm2 = vcmask 64512   ;;  %vm1687_vm3 = vcmask 58368   ;;  %vm1702_vm4 = vcmask 1041409  }
  0x44   :  { %312 = vmatprep.subr.bf16.mxu0 %v2006_v20  ;;  %v174_v58 = vrot.slane %v87_v56, %v173_v55  ;;  %v170_v59 = vrot.slane %v87_v56, %v169_v57  ;;  %v166_v6 = vrot.slane %v87_v56, %v2413_v60 }
  0x46   :  { %1913 = vmatpush3.bf16.msra.mxu1 %v2009_v22 }
  0x47   :  { %313 = vmatpush1.bf16.msra.mxu0 %v2008_v21  ;;  %1914 = vmatprep.subr.bf16.mxu1 %v2255_v4  ;;  %v2258_v21 = vmov 1966171168  }
  0x48   :  { %314 = vmatprep.subr.bf16.mxu0 %v2010_v23  ;;  %v480_v22 = vunpack.c.l.s4 %v2258_v21 }
  0x4a   :  { %1915 = vmatpush3.bf16.msra.mxu1 %v2013_v25  ;;  %v481_v23 = vunpack.c.0.s8 %v480_v22  ;;  %v2429_v25 = vld [vmem:[%s2608_s1] sm:$0x3] }
  0x4b   :  { %315 = vmatpush1.bf16.msra.mxu0 %v2012_v24  ;;  %1916 = vmatprep.subr.bf16.mxu1 %v2255_v4 }
  0x4c   :  { %316 = vmatprep.subr.bf16.mxu0 %v2014_v26  ;;  %v484_v24 = vsub.s32 %v481_v23, %v2401_v54 }
  0x4e   :  { %1917 = vmatpush3.bf16.msra.mxu1 %v2017_v28  ;;  %v485_v26 = vrot.slane %v2429_v25, %v484_v24 }
  0x4f   :  { %317 = vmatpush1.bf16.msra.mxu0 %v2016_v27  ;;  %1918 = vmatprep.subr.bf16.mxu1 %v2255_v4 }
  0x50   :  { %318 = vmatprep.subr.bf16.mxu0 %v2018_v29  ;;  %v2432_v27 = vrot.slane %v485_v26, %v484_v24  ;;  %v486_v29 = vcombine.high %v485_v26, %v485_v26 }
  0x52   :  { %1919 = vmatpush3.bf16.msra.mxu1 %v2021_v32  ;;  %v1748_v28 = vadd.f32 -1.0, %v2432_v27  ;;  %v2435_v32 = vrot.slane %v486_v29, %v484_v24 }
  0x53   :  { %319 = vmatpush1.bf16.msra.mxu0 %v2020_v31  ;;  %1920 = vmatprep.subr.bf16.mxu1 %v2255_v4 }
  0x54   :  { %320 = vmatprep.subr.bf16.mxu0 %v2022_v33  ;;  %v505_v31 = vmul.f32 1e+09, %v1748_v28 }
  0x56   :  { %1921 = vmatpush3.bf16.msra.mxu1 %v2025_v35  ;;  %v512_v33 = vrot.slane %v505_v31, %v2413_v60 }
  0x57   :  { %321 = vmatpush1.bf16.msra.mxu0 %v2024_v34  ;;  %1926 = vmatprep.subr.bf16.mxu1 %v2255_v4  ;;  %v1749_v34 = vadd.f32 -1.0, %v2435_v32 }
  0x58   :  { %1938 = vmatprep.subr.bf16.mxu0 %v2255_v4 }
  0xc6   :  { %v95_v7 = vpop.xlane.xlu0 %94 }
  0xc7   :  { %v99_v8 = vmul.f32 0.0078125, %v95_v7 }
  0xc9   :  { %v2364_v9 = vsub.f32 %v91_v0, %v99_v8 }
  0xca   :  { %v97_v10 = vpop.xlane.xlu0 %96 }
  0xcb   :  { %v100_v11 = vmul.f32 0.0078125, %v97_v10  ;;  %v103_v12 = vmul.f32 %v2364_v9, %v2364_v9 }
  0xcd   :  { %v2368_v13 = vsub.f32 %v92_v1, %v100_v11  ;;  %105 = vadd.xlane.f32.xlu1 %v103_v12 }
  0xcf   :  { %v104_v14 = vmul.f32 %v2368_v13, %v2368_v13 }
  0xd1   :  { %107 = vadd.xlane.f32.xlu1 %v104_v14 }
 0x15a   :  { %v106_v36 = vpop.xlane.xlu1 %105 }
 0x15b   :  { %v109_v37 = vmul.f32 0.0078125, %v106_v36 }
 0x15d   :  { %v111_v38 = vadd.f32 1e-12, %v109_v37 }
 0x15e   :  { %v108_v39 = vpop.xlane.xlu1 %107 }
 0x15f   :  { %2114 = vrsqrt.f32 %v111_v38  ;;  %v110_v40 = vmul.f32 0.0078125, %v108_v39 }
 0x161   :  { %v112_v41 = vadd.f32 1e-12, %v110_v40 }
 0x163   :  { %2116 = vrsqrt.f32 %v112_v41  ;;  %v506_v41 = vmul.f32 1e+09, %v1749_v34 }
 0x169   :  { %v2115_v42 = vpop.eup %2114 }
 0x16a   :  { %v115_v43 = vmul.f32 %v2115_v42, %v2364_v9 }
 0x16c   :  { %v121_v47 = vmul.f32 %v1722_v44, %v115_v43  ;;  %v516_v43 = vrot.slane %v506_v41, %v2413_v60 }
 0x16d   :  { %v2117_v45 = vpop.eup %2116 }
 0x16e   :  { %v116_v46 = vmul.f32 %v2117_v45, %v2368_v13  ;;  %v2391_v50 = vadd.f32 %v1723_v48, %v121_v47 }
 0x170   :  { %v122_v49 = vmul.f32 %v1722_v44, %v116_v46 }
 0x172   :  { %v2393_v51 = vadd.f32 %v1723_v48, %v122_v49 }
 0x174   :  { %v129_v52 = vpack.c.bf16 %v2393_v51, %v2391_v50 }
 0x176   :  { %339 = vmatmul.mubr.bf16.vlgmr.msra.gmra.mrb[0].mxu0 %v129_v52  ;;  %1923 = vmatmul.mubr.bf16.vlgmr.msra.gmra.mrb[0].mxu1 %v129_v52 }
 0x177   :  { %1928 = vmatprep.mubr.msk.bf16.mxu1 %vm2257_vm0, %v2255_v4  ;;  %1940 = vmatprep.mubr.msk.bf16.mxu0 %vm2257_vm0, %v2255_v4 }
 0x249   :  { %v340_v61 = vpop.f32.mrb[0].mxu0  ;;  %v383_v62 = vpop.f32.mrb[0].mxu1 }
 0x24a   :  { %v384_v63 = vadd.f32 %v383_v62, %v174_v58  ;;  %v342_v0 = vpop.f32.mrb[1].mxu0  ;;  %v1924_v1 = vpop.f32.mrb[1].mxu1  ;;  %v341_v12 = vadd.f32 %v340_v61, %v166_v6 }
 0x24b   :  { %v343_v2 = vadd.f32 %v342_v0, %v170_v59  ;;  %v344_v3 = vpop.f32.mrb[2].mxu0  ;;  %v386_v5 = vpop.f32.mrb[2].mxu1 }
 0x24c   :  { %v394_v7 = vpack.c.bf16 %v384_v63, %v384_v63  ;;  %v346_v8 = vpop.f32.mrb[3].mxu0  ;;  %v1925_v9 = vpop.f32.mrb[3].mxu1  ;;  %v390_v14 = vpack.c.bf16 %v341_v12, %v341_v12  ;;  %v387_v16 = vadd.f32 %v386_v5, %v174_v58  ;;  %v345_v17 = vadd.f32 %v344_v3, %v166_v6 }
 0x24d   :  { %v392_v10 = vpack.c.bf16 %v343_v2, %v343_v2  ;;  %v347_v13 = vadd.f32 %v346_v8, %v170_v59  ;;  %v2026_v8 = vld [vmem:[%s2611_s4] sm:$0xff]  }
 0x24e   :  { %v551_v11 = vsel %vm549_vm1, %v394_v7, 0  ;;  %v395_v18 = vpack.c.bf16 %v387_v16, %v387_v16  ;;  %v391_v19 = vpack.c.bf16 %v345_v17, %v345_v17  ;;  %v2030_v16 = vld [vmem:[%s2611_s4 + $0x20] sm:$0xff]   ;;  %v2031_v17 = vld [vmem:[%s2611_s4 + $0x28] sm:$0xff]  }
 0x24f   :  { %1927 = vmatpush3.bf16.xpose.msra.mxu1 %v392_v10  ;;  %1939 = vmatpush3.bf16.msra.mxu0 %v551_v11  ;;  %v393_v15 = vpack.c.bf16 %v347_v13, %v347_v13  ;;  %v2027_v10 = vld [vmem:[%s2611_s4 + $0x8] sm:$0xff]   ;;  %v2028_v13 = vld [vmem:[%s2611_s4 + $0x10] sm:$0xff]  }
 0x250   :  { %1932 = vmatprep.subr.bf16.mxu1 %v2255_v4  ;;  %1950 = vmatprep.subr.bf16.mxu0 %v2255_v4  ;;  %v597_v20 = vsel %vm549_vm1, %v395_v18, 0  ;;  %v2032_v18 = vld [vmem:[%s2611_s4 + $0x30] sm:$0xff]  }
 0x256   :  { %1929 = vmatmul.mubr.bf16.vlgmr.msra.gmra.mrb[4].mxu1 %v390_v14 }
 0x257   :  { %1933 = vmatpush3.bf16.xpose.msra.mxu1 %v393_v15  ;;  %1934 = vmatprep.mubr.msk.bf16.mxu1 %vm2257_vm0, %v2255_v4  ;;  %v2029_v15 = vld [vmem:[%s2611_s4 + $0x18] sm:$0xff]  }
 0x258   :  { %1944 = vmatprep.subr.bf16.mxu1 %v2255_v4 }
 0x25e   :  { %1935 = vmatmul.mubr.bf16.vlgmr.msra.gmra.mrb[8].mxu1 %v391_v19  ;;  %v2033_v19 = vld [vmem:[%s2611_s4 + $0x38] sm:$0xff]  }
 0x25f   :  { %1945 = vmatpush3.bf16.msra.mxu1 %v597_v20  ;;  %1946 = vmatprep.mubr.msk.bf16.mxu1 %vm2257_vm0, %v2255_v4 }
 0x329   :  { %v430_v35 = vpop.f32.mrb[4].mxu1 }
 0x32a   :  { %v476_v36 = vmul.f32 0.088388346, %v430_v35  ;;  %v1930_v37 = vpop.f32.mrb[5].mxu1 }
 0x32b   :  { %v433_v38 = vpop.f32.mrb[6].mxu1 }
 0x32c   :  { %v1931_v39 = vpop.f32.mrb[7].mxu1  ;;  %v519_v40 = vadd.f32 %v512_v33, %v476_v36  ;;  %v1752_v33 = vld [vmem:[%s2612_s5] ss:$0 sm:$0xff] }
 0x32e   :  { %v522_v42 = vsel %vm521_vm2, %v519_v40, -inf }
 0x32f   :  { %523 = vmax.xlane.f32.xlu0 %v522_v42  ;;  %v2034_v42 = vld [vmem:[#allocation5] ss:$16 sps:$4 sm:$0xff]  }
 0x331   :  { %v470_v44 = vpop.f32.mrb[8].mxu1 }
 0x332   :  { %v477_v45 = vmul.f32 0.088388346, %v470_v44  ;;  %v1936_v46 = vpop.f32.mrb[9].mxu1  ;;  %v2037_v44 = vld [vmem:[#allocation5 + $0x8] ss:$16 sps:$4 sm:$0xff]  }
 0x333   :  { %v473_v47 = vpop.f32.mrb[10].mxu1  ;;  %v2045_v46 = vld [vmem:[#allocation5 + $0x2c] ss:$16 sps:$4 sm:$0xff]  }
 0x334   :  { %v1937_v48 = vpop.f32.mrb[11].mxu1  ;;  %v520_v49 = vadd.f32 %v516_v43, %v477_v45  ;;  %v2036_v43 = vld [vmem:[#allocation5 + $0x4] ss:$16 sps:$4 sm:$0xff]   ;;  %v2040_v47 = vld [vmem:[#allocation5 + $0x20] ss:$16 sps:$4 sm:$0xff]  }
 0x335   :  { %v2042_v45 = vld [vmem:[#allocation5 + $0x24] ss:$16 sps:$4 sm:$0xff]   ;;  %1001 = vmatprep.subr.bf16.mxu1 %v2036_v43  ;;  %v2043_v48 = vld [vmem:[#allocation5 + $0x28] ss:$16 sps:$4 sm:$0xff]  }
 0x336   :  { %v525_v52 = vsel %vm521_vm2, %v520_v49, -inf  ;;  %v2082_v43 = vld [vmem:[#allocation7 + $0x40] sm:$0xff]  }
 0x337   :  { %526 = vmax.xlane.f32.xlu1 %v525_v52 }
 0x3bc   :  { %v524_v53 = vpop.xlane.xlu0 %523 }
 0x3bd   :  { %v528_v56 = vsub.f32 %v519_v40, %v524_v53 }
 0x3bf   :  { %v530_v58 = vmul.f32 1.442695, %v528_v56 }
 0x3c1   :  { %2118 = vpow2.f32 %v530_v58 }
 0x3c4   :  { %v527_v59 = vpop.xlane.xlu1 %526 }
 0x3c5   :  { %v529_v61 = vsub.f32 %v520_v49, %v527_v59 }
 0x3c7   :  { %v532_v62 = vmul.f32 1.442695, %v529_v61  ;;  %v2048_v61 = vld [vmem:[#allocation5 + $0x44] ss:$16 sps:$4 sm:$0xff]  }
 0x3c9   :  { %2120 = vpow2.f32 %v532_v62  ;;  %v2051_v62 = vld [vmem:[#allocation5 + $0x4c] ss:$16 sps:$4 sm:$0xff]  }
 0x3cb   :  { %v2119_v63 = vpop.eup %2118 }
 0x3cc   :  { %v534_v0 = vsel %vm521_vm2, %v2119_v63, 0.0 }
 0x3cd   :  { %535 = vadd.xlane.f32.xlu0 %v534_v0  ;;  %v2049_v0 = vld [vmem:[#allocation5 + $0x48] ss:$16 sps:$4 sm:$0xff]  }
 0x3d3   :  { %v2121_v1 = vpop.eup %2120 }
 0x3d4   :  { %v537_v2 = vsel %vm521_vm2, %v2121_v1, 0.0 }
 0x3d5   :  { %538 = vadd.xlane.f32.xlu1 %v537_v2  ;;  %v2057_v2 = vld [vmem:[#allocation5 + $0x6c] ss:$16 sps:$4 sm:$0xff]  }
 0x45a   :  { %v536_v3 = vpop.xlane.xlu0 %535 }
 0x45b   :  { %2122 = vrcp.f32 %v536_v3  ;;  %v2052_v3 = vld [vmem:[#allocation5 + $0x60] ss:$16 sps:$4 sm:$0xff]  }
 0x462   :  { %v539_v5 = vpop.xlane.xlu1 %538 }
 0x463   :  { %2124 = vrcp.f32 %v539_v5  ;;  %v2055_v5 = vld [vmem:[#allocation5 + $0x68] ss:$16 sps:$4 sm:$0xff]  }
 0x465   :  { %v2123_v6 = vpop.eup %2122 }
 0x466   :  { %v542_v7 = vmul.f32 %v2123_v6, %v2119_v63  ;;  %v2046_v63 = vld [vmem:[#allocation5 + $0x40] ss:$16 sps:$4 sm:$0xff]   ;;  %v2060_v6 = vld [vmem:[#allocation5 + $0x84] ss:$16 sps:$4 sm:$0xff]  }
 0x468   :  { %v544_v9 = vpack.c.bf16 %v542_v7, %v542_v7  ;;  %v2063_v7 = vld [vmem:[#allocation5 + $0x8c] ss:$16 sps:$4 sm:$0xff]  }
 0x46a   :  { %1941 = vmatmul.mubr.msk.bf16.vlgmr.msra.gmra.mrb[4].mxu0 %vm521_vm2, %v544_v9  ;;  %v2061_v9 = vld [vmem:[#allocation5 + $0x88] ss:$16 sps:$4 sm:$0xff]  }
 0x46b   :  { %1951 = vmatpush3.bf16.msra.mxu0 %v2026_v8  ;;  %1966 = vmatprep.mubr.msk.bf16.mxu0 %vm2257_vm0, %v2255_v4  ;;  %v2058_v8 = vld [vmem:[#allocation5 + $0x80] ss:$16 sps:$4 sm:$0xff]  }
 0x46c   :  { %1952 = vmatprep.subr.bf16.mxu0 %v2255_v4 }
 0x46d   :  { %v2125_v11 = vpop.eup %2124 }
 0x46e   :  { %v543_v12 = vmul.f32 %v2125_v11, %v2121_v1  ;;  %v2054_v1 = vld [vmem:[#allocation5 + $0x64] ss:$16 sps:$4 sm:$0xff]   ;;  %v2069_v11 = vld [vmem:[#allocation5 + $0xac] ss:$16 sps:$4 sm:$0xff]  }
 0x46f   :  { %1953 = vmatpush3.bf16.msra.mxu0 %v2027_v10  ;;  %v2066_v10 = vld [vmem:[#allocation5 + $0xa4] ss:$16 sps:$4 sm:$0xff]  }
 0x470   :  { %v545_v14 = vpack.c.bf16 %v543_v12, %v543_v12  ;;  %1954 = vmatprep.subr.bf16.mxu0 %v2255_v4  ;;  %v2064_v12 = vld [vmem:[#allocation5 + $0xa0] ss:$16 sps:$4 sm:$0xff]  }
 0x472   :  { %1947 = vmatmul.mubr.msk.bf16.vlgmr.msra.gmra.mrb[12].mxu1 %vm521_vm2, %v545_v14  ;;  %v2072_v14 = vld [vmem:[#allocation5 + $0xc4] ss:$16 sps:$4 sm:$0xff]  }
 0x473   :  { %1955 = vmatpush3.bf16.msra.mxu0 %v2028_v13  ;;  %1033 = vmatprep.mubr.bf16.mxu1 %v2256_v30  ;;  %v2067_v13 = vld [vmem:[#allocation5 + $0xa8] ss:$16 sps:$4 sm:$0xff]  }
 0x474   :  { %1956 = vmatprep.subr.bf16.mxu0 %v2255_v4  ;;  %1002 = vmatpush1.bf16.msra.mxu1 %v2034_v42 }
 0x475   :  { %1003 = vmatprep.subr.bf16.mxu1 %v2042_v45  ;;  %v2085_v45 = vld [vmem:[#allocation7 + $0x80] sm:$0xff]  }
 0x477   :  { %1957 = vmatpush3.bf16.msra.mxu0 %v2029_v15  ;;  %v2075_v15 = vld [vmem:[#allocation5 + $0xcc] ss:$16 sps:$4 sm:$0xff]  }
 0x478   :  { %1958 = vmatprep.subr.bf16.mxu0 %v2255_v4  ;;  %1004 = vmatpush1.bf16.msra.mxu1 %v2040_v47  ;;  %v2087_v47 = vld [vmem:[#allocation7 + $0xc8] sm:$0xff]  }
 0x479   :  { %1005 = vmatprep.subr.bf16.mxu1 %v2048_v61  ;;  %v2097_v61 = vld [vmem:[#allocation7 + $0x98] sm:$0xff]  }
 0x47b   :  { %1959 = vmatpush3.bf16.msra.mxu0 %v2030_v16  ;;  %v2070_v16 = vld [vmem:[#allocation5 + $0xc0] ss:$16 sps:$4 sm:$0xff]  }
 0x47c   :  { %1960 = vmatprep.subr.bf16.mxu0 %v2255_v4  ;;  %1006 = vmatpush1.bf16.msra.mxu1 %v2046_v63  ;;  %v2099_v63 = vld [vmem:[#allocation7 + $0xe0] sm:$0xff]  }
 0x47d   :  { %1007 = vmatprep.subr.bf16.mxu1 %v2054_v1  ;;  %v2101_v1 = vld [vmem:[#allocation7 + $0xa0] sm:$0xff]  }
 0x47f   :  { %1961 = vmatpush3.bf16.msra.mxu0 %v2031_v17  ;;  %v2073_v17 = vld [vmem:[#allocation5 + $0xc8] ss:$16 sps:$4 sm:$0xff]  }
 0x480   :  { %1962 = vmatprep.subr.bf16.mxu0 %v2255_v4  ;;  %1008 = vmatpush1.bf16.msra.mxu1 %v2052_v3  ;;  %v2103_v3 = vld [vmem:[#allocation7 + $0xe8] sm:$0xff]  }
 0x481   :  { %1009 = vmatprep.subr.bf16.mxu1 %v2060_v6  ;;  %v2105_v6 = vld [vmem:[#allocation7 + $0xa8] sm:$0xff]  }
 0x483   :  { %1963 = vmatpush3.bf16.msra.mxu0 %v2032_v18  ;;  %v2078_v18 = vld [vmem:[#allocation5 + $0xe4] ss:$16 sps:$4 sm:$0xff]  }
 0x484   :  { %1964 = vmatprep.subr.bf16.mxu0 %v2255_v4  ;;  %1010 = vmatpush1.bf16.msra.mxu1 %v2058_v8  ;;  %v2107_v8 = vld [vmem:[#allocation7 + $0xf0] sm:$0xff]  }
 0x485   :  { %1011 = vmatprep.subr.bf16.mxu1 %v2066_v10  ;;  %v2109_v10 = vld [vmem:[#allocation7 + $0xb0] sm:$0xff]  }
 0x487   :  { %1965 = vmatpush3.bf16.msra.mxu0 %v2033_v19  ;;  %v2076_v19 = vld [vmem:[#allocation5 + $0xe0] ss:$16 sps:$4 sm:$0xff]  }
 0x488   :  { %1012 = vmatpush1.bf16.msra.mxu1 %v2064_v12  ;;  %v2111_v12 = vld [vmem:[#allocation7 + $0xf8] sm:$0xff]  }
 0x489   :  { %1013 = vmatprep.subr.bf16.mxu1 %v2072_v14  ;;  %v2113_v14 = vld [vmem:[#allocation7 + $0xb8] sm:$0xff]  }
 0x48c   :  { %1014 = vmatpush1.bf16.msra.mxu1 %v2070_v16  ;;  %v835_v16 = vsub.s32 3, %v2401_v54 }
 0x48d   :  { %1015 = vmatprep.subr.bf16.mxu1 %v2078_v18 }
 0x490   :  { %1016 = vmatpush1.bf16.msra.mxu1 %v2076_v19 }
 0x491   :  { %1858 = vmatprep.subr.bf16.mxu1 %v2082_v43 }
 0x53d   :  { %v587_v20 = vpop.f32.mrb[4].mxu0 }
 0x53e   :  { %v1942_v21 = vpop.f32.mrb[5].mxu0 }
 0x53f   :  { %v590_v22 = vpop.f32.mrb[6].mxu0  ;;  %v2081_v21 = vld [vmem:[#allocation5 + $0xec] ss:$16 sps:$4 sm:$0xff]  }
 0x540   :  { %v1943_v23 = vpop.f32.mrb[7].mxu0 }
 0x545   :  { %v633_v24 = vpop.f32.mrb[12].mxu1 }
 0x546   :  { %v639_v26 = vpack.c.bf16 %v633_v24, %v587_v20  ;;  %v1948_v28 = vpop.f32.mrb[13].mxu1  ;;  %v2079_v20 = vld [vmem:[#allocation5 + $0xe8] ss:$16 sps:$4 sm:$0xff]  }
 0x547   :  { %v636_v29 = vpop.f32.mrb[14].mxu1 }
 0x548   :  { %v1949_v31 = vpop.f32.mrb[15].mxu1  ;;  %1967 = vmatmul.mubr.bf16.vlgmr.msra.gmra.mrb[8].mxu0 %v639_v26 }
 0x549   :  { %1076 = vmatprep.mubr.bf16.mxu0 %v2256_v30  ;;  %v2039_v30 = vld [vmem:[#allocation5 + $0xc] ss:$16 sps:$4 sm:$0xff]  }
 0x54a   :  { %1044 = vmatprep.subr.bf16.mxu0 %v2039_v30  ;;  %v2084_v30 = vld [vmem:[#allocation7] sm:$0xff]  }
 0x54b   :  { %1045 = vmatpush1.bf16.msra.mxu0 %v2037_v44  ;;  %v2083_v44 = vld [vmem:[#allocation7 + $0xc0] sm:$0xff]  }
 0x54c   :  { %1046 = vmatprep.subr.bf16.mxu0 %v2045_v46  ;;  %v2086_v46 = vld [vmem:[#allocation7 + $0x48] sm:$0xff]  }
 0x54f   :  { %1047 = vmatpush1.bf16.msra.mxu0 %v2043_v48  ;;  %v2088_v48 = vld [vmem:[#allocation7 + $0x8] sm:$0xff]  }
 0x550   :  { %1048 = vmatprep.subr.bf16.mxu0 %v2051_v62  ;;  %v2098_v62 = vld [vmem:[#allocation7 + $0x60] sm:$0xff]  }
 0x553   :  { %1049 = vmatpush1.bf16.msra.mxu0 %v2049_v0  ;;  %v2100_v0 = vld [vmem:[#allocation7 + $0x20] sm:$0xff]  }
 0x554   :  { %1050 = vmatprep.subr.bf16.mxu0 %v2057_v2  ;;  %v2102_v2 = vld [vmem:[#allocation7 + $0x68] sm:$0xff]  }
 0x557   :  { %1051 = vmatpush1.bf16.msra.mxu0 %v2055_v5  ;;  %v2104_v5 = vld [vmem:[#allocation7 + $0x28] sm:$0xff]  }
 0x558   :  { %1052 = vmatprep.subr.bf16.mxu0 %v2063_v7  ;;  %v2106_v7 = vld [vmem:[#allocation7 + $0x70] sm:$0xff]  }
 0x55b   :  { %1053 = vmatpush1.bf16.msra.mxu0 %v2061_v9  ;;  %v2108_v9 = vld [vmem:[#allocation7 + $0x30] sm:$0xff]  }
 0x55c   :  { %1054 = vmatprep.subr.bf16.mxu0 %v2069_v11  ;;  %v2110_v11 = vld [vmem:[#allocation7 + $0x78] sm:$0xff]  }
 0x55f   :  { %1055 = vmatpush1.bf16.msra.mxu0 %v2067_v13  ;;  %v2112_v13 = vld [vmem:[#allocation7 + $0x38] sm:$0xff]  }
 0x560   :  { %1056 = vmatprep.subr.bf16.mxu0 %v2075_v15  ;;  %v89_v15 = vld [vmem:[%s2614_s7] sm:$0xf] }
 0x561   :  { %v832_v18 = vrot.slane %v89_v15, %v173_v55  ;;  %v828_v19 = vrot.slane %v89_v15, %v169_v57 }
 0x563   :  { %1057 = vmatpush1.bf16.msra.mxu0 %v2073_v17  ;;  %v824_v17 = vrot.slane %v89_v15, %v2413_v60 }
 0x564   :  { %1058 = vmatprep.subr.bf16.mxu0 %v2081_v21 }
 0x567   :  { %1059 = vmatpush1.bf16.msra.mxu0 %v2079_v20  ;;  %v836_v20 = vrot.slane %v89_v15, %v835_v16 }
 0x568   :  { %1880 = vmatprep.subr.bf16.mxu0 %v2083_v44 }
 0x61b   :  { %v744_v34 = vpop.f32.mrb[8].mxu0 }
 0x61c   :  { %v745_v35 = vadd.f32 %v1752_v33, %v744_v34  ;;  %v1968_v36 = vpop.f32.mrb[9].mxu0 }
 0x61d   :  { %v747_v37 = vpop.f32.mrb[10].mxu0 }
 0x61e   :  { %v748_v38 = vadd.f32 %v1752_v33, %v747_v37  ;;  %v1969_v39 = vpop.f32.mrb[11].mxu0  ;;  %v751_v40 = vadd.f32 %v745_v35, %v2391_v50  ;;  %v1761_v33 = vld [vmem:[%s2617_s10 + $0x2] ss:$0 sm:$0xff] }
 0x620   :  { %753 = vadd.xlane.f32.xlu0 %v751_v40  ;;  %v752_v41 = vadd.f32 %v748_v38, %v2393_v51  ;;  %v1762_v38 = vld [vmem:[%s2617_s10 + $0x3] ss:$0 sm:$0xff] }
 0x622   :  { %755 = vadd.xlane.f32.xlu1 %v752_v41 }
 0x6ad   :  { %v754_v50 = vpop.xlane.xlu0 %753 }
 0x6ae   :  { %v757_v49 = vmul.f32 0.0078125, %v754_v50  ;;  %v2089_v50 = vld [vmem:[#allocation7 + $0x88] sm:$0xff]  }
 0x6af   :  { %v756_v51 = vpop.xlane.xlu1 %755 }
 0x6b0   :  { %v2486_v52 = vsub.f32 %v751_v40, %v757_v49  ;;  %v758_v53 = vmul.f32 0.0078125, %v756_v51  ;;  %v2090_v49 = vld [vmem:[#allocation7 + $0x50] sm:$0xff]  }
 0x6b1   :  { %v2091_v51 = vld [vmem:[#allocation7 + $0xd0] sm:$0xff]  }
 0x6b2   :  { %v2488_v56 = vsub.f32 %v752_v41, %v758_v53  ;;  %v761_v58 = vmul.f32 %v2486_v52, %v2486_v52  ;;  %v2093_v53 = vld [vmem:[#allocation7 + $0x90] sm:$0xff]  }
 0x6b4   :  { %763 = vadd.xlane.f32.xlu0 %v761_v58  ;;  %v762_v59 = vmul.f32 %v2488_v56, %v2488_v56  ;;  %v2095_v58 = vld [vmem:[#allocation7 + $0xd8] sm:$0xff]  }
 0x6b6   :  { %765 = vadd.xlane.f32.xlu1 %v762_v59  ;;  %v2096_v59 = vld [vmem:[#allocation7 + $0x18] sm:$0xff]  }
 0x741   :  { %v764_v22 = vpop.xlane.xlu0 %763 }
 0x742   :  { %v767_v23 = vmul.f32 0.0078125, %v764_v22 }
 0x743   :  { %v766_v24 = vpop.xlane.xlu1 %765 }
 0x744   :  { %v769_v26 = vadd.f32 1e-12, %v767_v23  ;;  %v768_v28 = vmul.f32 0.0078125, %v766_v24 }
 0x746   :  { %2126 = vrsqrt.f32 %v769_v26  ;;  %v770_v29 = vadd.f32 1e-12, %v768_v28 }
 0x748   :  { %2128 = vrsqrt.f32 %v770_v29 }
 0x750   :  { %v2127_v31 = vpop.eup %2126 }
 0x751   :  { %v773_v34 = vmul.f32 %v2127_v31, %v2486_v52  ;;  %v2092_v52 = vld [vmem:[#allocation7 + $0x10] sm:$0xff]  }
 0x752   :  { %v2129_v35 = vpop.eup %2128 }
 0x753   :  { %v774_v36 = vmul.f32 %v2129_v35, %v2488_v56  ;;  %v779_v37 = vmul.f32 %v1761_v33, %v773_v34  ;;  %v2094_v56 = vld [vmem:[#allocation7 + $0x58] sm:$0xff]  }
 0x755   :  { %v780_v39 = vmul.f32 %v1761_v33, %v774_v36  ;;  %v2502_v40 = vadd.f32 %v1762_v38, %v779_v37 }
 0x757   :  { %v2504_v41 = vadd.f32 %v1762_v38, %v780_v39 }
 0x759   :  { %v787_v42 = vpack.c.bf16 %v2504_v41, %v2502_v40 }
 0x75b   :  { %1034 = vmatmul.mubr.bf16.vlgmr.msra.gmra.mrb[16].mxu1 %v787_v42  ;;  %1077 = vmatmul.mubr.bf16.vlgmr.msra.gmra.mrb[12].mxu0 %v787_v42 }
 0x75c   :  { %1859 = vmatpush3.bf16.msra.mxu1 %v2084_v30  ;;  %1881 = vmatpush3.bf16.msra.mxu0 %v2085_v45 }
 0x75d   :  { %1860 = vmatprep.subr.bf16.mxu1 %v2086_v46  ;;  %1882 = vmatprep.subr.bf16.mxu0 %v2087_v47 }
 0x760   :  { %1861 = vmatpush3.bf16.msra.mxu1 %v2088_v48  ;;  %1883 = vmatpush3.bf16.msra.mxu0 %v2089_v50 }
 0x761   :  { %1862 = vmatprep.subr.bf16.mxu1 %v2090_v49  ;;  %1884 = vmatprep.subr.bf16.mxu0 %v2091_v51 }
 0x764   :  { %1863 = vmatpush3.bf16.msra.mxu1 %v2092_v52  ;;  %1885 = vmatpush3.bf16.msra.mxu0 %v2093_v53 }
 0x765   :  { %1864 = vmatprep.subr.bf16.mxu1 %v2094_v56  ;;  %1886 = vmatprep.subr.bf16.mxu0 %v2095_v58 }
 0x768   :  { %1865 = vmatpush3.bf16.msra.mxu1 %v2096_v59  ;;  %1887 = vmatpush3.bf16.msra.mxu0 %v2097_v61 }
 0x769   :  { %1866 = vmatprep.subr.bf16.mxu1 %v2098_v62  ;;  %1888 = vmatprep.subr.bf16.mxu0 %v2099_v63 }
 0x76c   :  { %1867 = vmatpush3.bf16.msra.mxu1 %v2100_v0  ;;  %1889 = vmatpush3.bf16.msra.mxu0 %v2101_v1 }
 0x76d   :  { %1868 = vmatprep.subr.bf16.mxu1 %v2102_v2  ;;  %1890 = vmatprep.subr.bf16.mxu0 %v2103_v3 }
 0x770   :  { %1869 = vmatpush3.bf16.msra.mxu1 %v2104_v5  ;;  %1891 = vmatpush3.bf16.msra.mxu0 %v2105_v6 }
 0x771   :  { %1870 = vmatprep.subr.bf16.mxu1 %v2106_v7  ;;  %1892 = vmatprep.subr.bf16.mxu0 %v2107_v8 }
 0x774   :  { %1871 = vmatpush3.bf16.msra.mxu1 %v2108_v9  ;;  %1893 = vmatpush3.bf16.msra.mxu0 %v2109_v10 }
 0x775   :  { %1872 = vmatprep.subr.bf16.mxu1 %v2110_v11  ;;  %1894 = vmatprep.subr.bf16.mxu0 %v2111_v12 }
 0x778   :  { %1873 = vmatpush3.bf16.msra.mxu1 %v2112_v13  ;;  %1895 = vmatpush3.bf16.msra.mxu0 %v2113_v14 }
 0x779   :  { %1970 = vmatprep.subr.mxu1 %v2255_v4 }
 0x82e   :  { %v1035_v21 = vpop.f32.mrb[16].mxu1  ;;  %v1078_v22 = vpop.f32.mrb[12].mxu0 }
 0x82f   :  { %v2518_v23 = vadd.f32 %v1035_v21, %v824_v17  ;;  %v2520_v24 = vadd.f32 %v1078_v22, %v832_v18  ;;  %v1037_v26 = vpop.f32.mrb[17].mxu1  ;;  %v1080_v28 = vpop.f32.mrb[13].mxu0 }
 0x830   :  { %v2522_v29 = vadd.f32 %v1037_v26, %v828_v19  ;;  %v2524_v31 = vadd.f32 %v1080_v28, %v836_v20  ;;  %v1039_v60 = vpop.f32.mrb[18].mxu1  ;;  %v1082_v33 = vpop.f32.mrb[14].mxu0 }
 0x831   :  { %v1087_v55 = vmul.f32 %v2518_v23, %v2518_v23  ;;  %v1089_v54 = vmul.f32 %v2520_v24, %v2520_v24  ;;  %v2530_v57 = vadd.f32 %v1039_v60, %v824_v17  ;;  %v2532_v34 = vadd.f32 %v1082_v33, %v832_v18  ;;  %v1041_v35 = vpop.f32.mrb[19].mxu1  ;;  %v1084_v36 = vpop.f32.mrb[15].mxu0 }
 0x832   :  { %v1088_v37 = vmul.f32 %v2522_v29, %v2522_v29  ;;  %v1090_v38 = vmul.f32 %v2524_v31, %v2524_v31  ;;  %v2538_v39 = vadd.f32 %v1041_v35, %v828_v19  ;;  %v2540_v42 = vadd.f32 %v1084_v36, %v836_v20 }
 0x833   :  { %v1095_v43 = vmul.f32 %v1087_v55, %v2518_v23  ;;  %v1097_v44 = vmul.f32 %v1089_v54, %v2520_v24  ;;  %v1091_v30 = vmul.f32 %v2530_v57, %v2530_v57  ;;  %v1093_v45 = vmul.f32 %v2532_v34, %v2532_v34 }
 0x834   :  { %v1096_v46 = vmul.f32 %v1088_v37, %v2522_v29  ;;  %v1098_v47 = vmul.f32 %v1090_v38, %v2524_v31  ;;  %v1092_v48 = vmul.f32 %v2538_v39, %v2538_v39  ;;  %v1094_v50 = vmul.f32 %v2540_v42, %v2540_v42 }
 0x835   :  { %v1103_v49 = vmul.f32 0.044715, %v1095_v43  ;;  %v1105_v51 = vmul.f32 0.044715, %v1097_v44  ;;  %v1099_v52 = vmul.f32 %v1091_v30, %v2530_v57  ;;  %v1101_v53 = vmul.f32 %v1093_v45, %v2532_v34 }
 0x836   :  { %v1104_v56 = vmul.f32 0.044715, %v1096_v46  ;;  %v1106_v58 = vmul.f32 0.044715, %v1098_v47  ;;  %v1100_v59 = vmul.f32 %v1092_v48, %v2538_v39  ;;  %v1102_v61 = vmul.f32 %v1094_v50, %v2540_v42 }
 0x837   :  { %v1111_v62 = vadd.f32 %v1103_v49, %v2518_v23  ;;  %v1113_v63 = vadd.f32 %v1105_v51, %v2520_v24  ;;  %v1107_v0 = vmul.f32 0.044715, %v1099_v52  ;;  %v1109_v1 = vmul.f32 0.044715, %v1101_v53 }
 0x838   :  { %v1112_v2 = vadd.f32 %v1104_v56, %v2522_v29  ;;  %v1114_v3 = vadd.f32 %v1106_v58, %v2524_v31  ;;  %v1108_v5 = vmul.f32 0.044715, %v1100_v59  ;;  %v1110_v6 = vmul.f32 0.044715, %v1102_v61 }
 0x839   :  { %v1119_v7 = vmul.f32 0.7978846, %v1111_v62  ;;  %v1121_v8 = vmul.f32 0.7978846, %v1113_v63  ;;  %v1115_v9 = vadd.f32 %v1107_v0, %v2530_v57  ;;  %v1117_v10 = vadd.f32 %v1109_v1, %v2532_v34 }
 0x83a   :  { %v1120_v11 = vmul.f32 0.7978846, %v1112_v2  ;;  %v1122_v12 = vmul.f32 0.7978846, %v1114_v3  ;;  %v1116_v13 = vadd.f32 %v1108_v5, %v2538_v39  ;;  %v1118_v14 = vadd.f32 %v1110_v6, %v2540_v42 }
 0x83b   :  { %2130 = vtanh.f32 %v1119_v7  ;;  %v1123_v15 = vmul.f32 0.7978846, %v1115_v9  ;;  %v1125_v16 = vmul.f32 0.7978846, %v1117_v10 }
 0x83c   :  { %2132 = vtanh.f32 %v1121_v8  ;;  %v1124_v17 = vmul.f32 0.7978846, %v1116_v13  ;;  %v1126_v18 = vmul.f32 0.7978846, %v1118_v14 }
 0x83d   :  { %2134 = vtanh.f32 %v1120_v11 }
 0x83e   :  { %2136 = vtanh.f32 %v1122_v12 }
 0x83f   :  { %2138 = vtanh.f32 %v1123_v15 }
 0x840   :  { %2140 = vtanh.f32 %v1125_v16 }
 0x841   :  { %2142 = vtanh.f32 %v1124_v17 }
 0x842   :  { %2144 = vtanh.f32 %v1126_v18 }
 0x845   :  { %v2131_v19 = vpop.eup %2130 }
 0x846   :  { %v2133_v20 = vpop.eup %2132  ;;  %v1135_v21 = vadd.f32 1.0, %v2131_v19 }
 0x847   :  { %v2135_v22 = vpop.eup %2134  ;;  %v1137_v26 = vadd.f32 1.0, %v2133_v20 }
 0x848   :  { %v2137_v28 = vpop.eup %2136  ;;  %v1136_v60 = vadd.f32 1.0, %v2135_v22  ;;  %v1143_v35 = vmul.f32 0.5, %v1135_v21 }
 0x849   :  { %v2139_v33 = vpop.eup %2138  ;;  %v1138_v55 = vadd.f32 1.0, %v2137_v28  ;;  %v1145_v38 = vmul.f32 0.5, %v1137_v26  ;;  %v1688_v28 = vsel %vm1687_vm3, %v2429_v25, 0.0  ;;  %v1829_v25 = vld [vmem:[%s2617_s10 + $0x5] ss:$0 sm:$0xff] }
 0x84a   :  { %v2141_v54 = vpop.eup %2140  ;;  %v1139_v36 = vadd.f32 1.0, %v2139_v33  ;;  %v1144_v46 = vmul.f32 0.5, %v1136_v60  ;;  %v1151_v49 = vmul.f32 %v1143_v35, %v2518_v23 }
 0x84b   :  { %v2143_v37 = vpop.eup %2142  ;;  %v1141_v43 = vadd.f32 1.0, %v2141_v54  ;;  %v1146_v50 = vmul.f32 0.5, %v1138_v55  ;;  %v1153_v53 = vmul.f32 %v1145_v38, %v2520_v24 }
 0x84c   :  { %v2145_v44 = vpop.eup %2144  ;;  %v1147_v30 = vmul.f32 0.5, %v1139_v36  ;;  %v1140_v45 = vadd.f32 1.0, %v2143_v37  ;;  %v1152_v59 = vmul.f32 %v1144_v46, %v2522_v29  ;;  %v1795_v29 = vld [vmem:[%s2616_s9] ss:$0 sm:$0xff]  ;;  %v1828_v36 = vld [vmem:[%s2617_s10 + $0x4] ss:$0 sm:$0xff] }
 0x84d   :  { %v1149_v47 = vmul.f32 0.5, %v1141_v43  ;;  %v1142_v48 = vadd.f32 1.0, %v2145_v44  ;;  %v1154_v63 = vmul.f32 %v1146_v50, %v2524_v31  ;;  %s2259_s10 = smov [#allocation8]  }
 0x84e   :  { %v1155_v51 = vmul.f32 %v1147_v30, %v2530_v57  ;;  %v1148_v52 = vmul.f32 0.5, %v1140_v45  ;;  %s1712_s27 = sshll.u32 %s2259_s10, 4  ;;  %s1713_s27 = int_to_ptr.vmem [resolvable:$true] %s1712_s27 }
 0x84f   :  { %v1157_v56 = vmul.f32 %v1149_v47, %v2532_v34  ;;  %v1150_v58 = vmul.f32 0.5, %v1142_v48  ;;  %s2218_s28 = scalar_lea.vmem %s1713_s27, 32  ;;  %p2223_p11 = scmp.lt.s32.totalorder %s1713_s27, %s1713_s27 }
 0x850   :  { %v1156_v61 = vmul.f32 %v1148_v52, %v2538_v39  ;;  %v1159_v62 = vpack.c.bf16 %v1155_v51, %v1151_v49  ;;  %p2219_p10 = scmp.ne.s32.totalorder %s1713_s27, %s2218_s28  ;;  %p2224_p12 = scmp.lt.s32.totalorder %s2218_s28, %s2218_s28 }
 0x851   :  { %v1158_v0 = vmul.f32 %v1150_v58, %v2540_v42  ;;  %v1161_v1 = vpack.c.bf16 %v1157_v56, %v1153_v53 }
 0x852   :  { %v1160_v2 = vpack.c.bf16 %v1156_v61, %v1152_v59  ;;  %p2225_p13 = por %p2224_p12, %p2223_p11 }
 0x853   :  { %v1162_v23 = vpack.c.bf16 %v1158_v0, %v1154_v63 }
 0x854   :  { %1457 = vmatprep.mubr.bf16.mxu1 %v1160_v2  ;;  %p2226_p0 = pnand %p2225_p13, %p2219_p10 }
 0x855   :  { %1498 = vmatprep.mubr.bf16.mxu0 %v1162_v23  ;;  %1458 = vmatmul.mubr.bf16.vlgmr.msra.gmra.mrb[20].mxu1 %v1159_v62 }
 0x856   :  { %1499 = vmatmul.mubr.bf16.vlgmr.msra.gmra.mrb[16].mxu0 %v1161_v1  ;;  %1972 = vmatprep.mubr.msk.f32.mxu1 %vm2257_vm0, %v2255_v4 }
 0x928   :  { %v1874_v24 = vpop.f32.mrb[20].mxu1 }
 0x929   :  { %v1896_v57 = vpop.f32.mrb[16].mxu0  ;;  %v1875_v34 = vpop.f32.mrb[21].mxu1 }
 0x92a   :  { %v1876_v31 = vadd.f32 %v1875_v34, %v1874_v24  ;;  %v1897_v39 = vpop.f32.mrb[17].mxu0  ;;  %v1877_v42 = vpop.f32.mrb[22].mxu1 }
 0x92b   :  { %v1898_v3 = vadd.f32 %v1897_v39, %v1896_v57  ;;  %v1899_v5 = vpop.f32.mrb[18].mxu0  ;;  %v1878_v6 = vpop.f32.mrb[23].mxu1 }
 0x92c   :  { %v1460_v7 = vadd.f32 %v1876_v31, %v1795_v29  ;;  %v1879_v8 = vadd.f32 %v1878_v6, %v1877_v42  ;;  %v1900_v9 = vpop.f32.mrb[19].mxu0 }
 0x92d   :  { %v1901_v10 = vadd.f32 %v1900_v9, %v1899_v5 }
 0x92e   :  { %v1501_v11 = vadd.f32 %v1898_v3, %v1460_v7  ;;  %v1463_v12 = vadd.f32 %v1879_v8, %v1795_v29 }
 0x930   :  { %v1504_v13 = vadd.f32 %v1901_v10, %v1463_v12  ;;  %v1507_v14 = vadd.f32 %v1501_v11, %v2502_v40 }
 0x932   :  { %1509 = vadd.xlane.f32.xlu0 %v1507_v14  ;;  %v1508_v15 = vadd.f32 %v1504_v13, %v2504_v41 }
 0x934   :  { %1511 = vadd.xlane.f32.xlu1 %v1508_v15 }
 0x9bf   :  { %v1510_v16 = vpop.xlane.xlu0 %1509 }
 0x9c0   :  { %v1513_v17 = vmul.f32 0.0078125, %v1510_v16 }
 0x9c1   :  { %v1512_v18 = vpop.xlane.xlu1 %1511 }
 0x9c2   :  { %v1515_v19 = vsub.f32 %v1507_v14, %v1513_v17  ;;  %v1514_v20 = vmul.f32 0.0078125, %v1512_v18 }
 0x9c4   :  { %v1516_v21 = vsub.f32 %v1508_v15, %v1514_v20  ;;  %v1517_v22 = vmul.f32 %v1515_v19, %v1515_v19 }
 0x9c6   :  { %1519 = vadd.xlane.f32.xlu0 %v1517_v22  ;;  %v1518_v26 = vmul.f32 %v1516_v21, %v1516_v21 }
 0x9c8   :  { %1521 = vadd.xlane.f32.xlu1 %v1518_v26 }
 0x9ca   :  { %1689 = vadd.xlane.f32.xlu0 %v1688_v28 }
 0xa53   :  { %v1520_v60 = vpop.xlane.xlu0 %1519 }
 0xa54   :  { %v1523_v40 = vmul.f32 0.0078125, %v1520_v60 }
 0xa55   :  { %v1522_v33 = vpop.xlane.xlu1 %1521 }
 0xa56   :  { %v1525_v55 = vadd.f32 1e-12, %v1523_v40  ;;  %v1524_v41 = vmul.f32 0.0078125, %v1522_v33 }
 0xa57   :  { %v1690_v47 = vpop.xlane.xlu0 %1689 }
 0xa58   :  { %2146 = vrsqrt.f32 %v1525_v55  ;;  %v1526_v54 = vadd.f32 1e-12, %v1524_v41  ;;  %v1691_v48 = vmax.f32 %v1690_v47, 1e-09 }
 0xa5a   :  { %2148 = vrsqrt.f32 %v1526_v54 }
 0xa5b   :  { %2150 = vrcp.f32 %v1691_v48 }
 0xa62   :  { %v2147_v35 = vpop.eup %2146 }
 0xa63   :  { %v1529_v37 = vmul.f32 %v2147_v35, %v1515_v19 }
 0xa64   :  { %v2149_v38 = vpop.eup %2148 }
 0xa65   :  { %v1535_v43 = vmul.f32 %v1828_v36, %v1529_v37  ;;  %v1530_v44 = vmul.f32 %v2149_v38, %v1516_v21  ;;  %v2151_v50 = vpop.eup %2150 }
 0xa66   :  { %v1694_v52 = vrot.slane %v2151_v50, 1 }
 0xa67   :  { %v1541_v30 = vadd.f32 %v1829_v25, %v1535_v43  ;;  %v1536_v45 = vmul.f32 %v1828_v36, %v1530_v44 }
 0xa69   :  { %1971 = vmatpush3.msra.mxu1 %v1541_v30  ;;  %v1542_v46 = vadd.f32 %v1829_v25, %v1536_v45 }
 0xa6a   :  { %1975 = vmatprep.subr.mxu1 %v2255_v4  ;;  %1973 = vmatmul.mubr.msk.f32.vlgmr.msra.gmra.mrb[24].mxu1 %vm521_vm2, %v2432_v27 }
 0xa6b   :  { %1976 = vmatpush3.msra.mxu1 %v1542_v46  ;;  %1977 = vmatprep.mubr.msk.f32.mxu1 %vm2257_vm0, %v2255_v4 }
 0xa6e   :  { %1978 = vmatmul.mubr.msk.f32.vlgmr.msra.gmra.mrb[26].mxu1 %vm521_vm2, %v2435_v32 }
 0xb3d   :  { %v1611_v49 = vpop.f32.mrb[24].mxu1 }
 0xb3e   :  { %v1974_v51 = vpop.f32.mrb[25].mxu1  ;;  %v1697_v27 = vmul.f32 %v2151_v50, %v1611_v49 }
 0xb41   :  { %v1683_v53 = vpop.f32.mrb[26].mxu1 }
 0xb42   :  { %v1698_v56 = vmul.f32 %v1694_v52, %v1683_v53  ;;  %v1979_v58 = vpop.f32.mrb[27].mxu1 }
 0xb44   :  { %v1701_v59 = vrot.slane %v1698_v56, 7 }
 0xb46   :  { %v1703_v4 = vsel %vm1702_vm4, %v1701_v59, %v1697_v27 }
 0xb47   :  { %1705 = vst [vmem:[#allocation8] sm:$0x3] %v1703_v4 }
 0xb48   :  { %2229 = shalt.err (!%p2226_p0)
}
 0xb49   :  { %s2230_s12 = scalar_lea.hbm %s2618_s11, 32 }
 0xb4a   :  { %p2231_p1 = scmp.ne.s32.totalorder %s2618_s11, %s2230_s12  ;;  %p2234_p2 = scmp.lt.u32.totalorder %s2230_s12, %s2618_s11 }
 0xb4c   :  { %p2236_p3 = pnand %p2234_p2, %p2231_p1 }
 0xb4e   :  { %2239 = shalt.err (!%p2236_p3)
}
 0xb4f   :  { %1715 = dma.vmem_to_hbm [thread:$0]  %s1713_s27, 32, %s2618_s11, [#allocation4]  }
 0xb50   :  { %2244 = dma.done.wait [#allocation4], 32  }
 0xb51   :  { %2245 = vsyncadd [#allocation4], 4294967264 }
 0xb52   :  { %1719 = vsyncpa [#allocation3], 1 }
 0xb53   :  { %1720 = vsyncpa [#allocation6], 1 }
 0xb54   :  { %1721 = vsyncpa [#allocation4], 1 }

</bundles_post_ra>
